<compile_context>
chip_gen: v7x
topology: tpu7x:2x2x1
jax: 0.10.0
libtpu: 0.0.40
codegen_flags: <defaults>
</compile_context>

<pallas_src>
import math

import jax
import jax.numpy as jnp
from jax import lax
from jax.experimental import pallas as pl
from jax.experimental.pallas import tpu as pltpu


def mha_flash_kernel(q_ref, k_ref, v_ref,
                     wq_ref, bq_ref, wk_ref, bk_ref, wv_ref, bv_ref,
                     wo_ref, bo_ref,
                     out_ref,
                     qh_scr, m_scr, l_scr, acc_scr, out_scr):
    hi = pl.program_id(2)        # head (reduction for the output projection)
    kv = pl.program_id(3)        # kv block (online-softmax reduction)
    last_h = pl.num_programs(2) - 1
    last_kv = pl.num_programs(3) - 1

    # First reduction step for this (batch, q-block): reset the resident
    # output-projection accumulator.
    @pl.when(jnp.logical_and(hi == 0, kv == 0))
    def _():
        out_scr[...] = jnp.zeros_like(out_scr)

    # Once per (batch, q-block, head): project the (pre-scaled) Q block and
    # reset the online-softmax state.
    @pl.when(kv == 0)
    def _():
        qh_scr[...] = (jnp.dot(q_ref[0], wq_ref[...],
                               preferred_element_type=jnp.float32) + bq_ref[...])
        m_scr[...] = jnp.full_like(m_scr, -jnp.inf)
        l_scr[...] = jnp.zeros_like(l_scr)
        acc_scr[...] = jnp.zeros_like(acc_scr)

    # Per kv tile: project this head's K/V tile with its lane-dense (D, d_k)
    # weight column slice (weights stay resident in VMEM across the kv loop).
    kh = jnp.dot(k_ref[0], wk_ref[...], preferred_element_type=jnp.float32) + bk_ref[...]
    vh = jnp.dot(v_ref[0], wv_ref[...], preferred_element_type=jnp.float32) + bv_ref[...]

    # Scores without materializing K^T: contract d_k of both operands.
    s = lax.dot_general(qh_scr[...], kh, (((1,), (1,)), ((), ())),
                        preferred_element_type=jnp.float32)           # (tq, tkv)

    # Online softmax update.
    m_new = jnp.maximum(m_scr[...], jnp.max(s, axis=-1, keepdims=True))
    alpha = jnp.exp(m_scr[...] - m_new)
    p = jnp.exp(s - m_new)
    l_scr[...] = alpha * l_scr[...] + jnp.sum(p, axis=-1, keepdims=True)
    acc_scr[...] = alpha * acc_scr[...] + jnp.dot(p, vh, preferred_element_type=jnp.float32)
    m_scr[...] = m_new

    # End of this head's kv loop: normalize (approx reciprocal on the (tq, 1)
    # denominator -> EUP slot) and fold this head's contribution into the output
    # projection using rows hi*d_k:(hi+1)*d_k of w_o (delivered via BlockSpec).
    @pl.when(kv == last_kv)
    def _():
        ctx = acc_scr[...] * pl.reciprocal(l_scr[...], approx=True)   # (tq, d_k)
        out_scr[...] += jnp.dot(ctx, wo_ref[...], preferred_element_type=jnp.float32)

    # Last reduction step overall: add the output bias and store the tile once.
    @pl.when(jnp.logical_and(hi == last_h, kv == last_kv))
    def _():
        out_ref[0] = (out_scr[...] + bo_ref[...]).astype(out_ref.dtype)


def _pick_seq_tile(S):
    for t in (512, 256, 128):
        if S % t == 0:
            return t
    return S  # small-S fallback: whole sequence in one block


def multi_head_attention(q, k, v, params, *, h, tq=None, tkv=None):
    B, S, D = q.shape
    assert D % h == 0, "d_model is not divisible by h"
    d_k = D // h
    # Lane-dense per-head weight slices (the whole point of the head grid axis).
    assert d_k % 128 == 0 or h == 1, "head dim must be a multiple of 128 (or h == 1)"
    wq, bq, wk, bk, wv, bv, wo, bo = params

    # Fold the attention scale 1/sqrt(d_k) into the query projection (host side,
    # one-time O(D^2) work) so no (tq, tkv) scale multiply happens in-kernel.
    scale = 1.0 / math.sqrt(d_k)
    wq = wq * scale
    bq = bq * scale

    tq = _pick_seq_tile(S) if tq is None else tq
    tkv = _pick_seq_tile(S) if tkv is None else tkv
    assert S % tq == 0 and S % tkv == 0, "sequence must divide the tile sizes"
    nq, nkv = S // tq, S // tkv
    grid = (B, nq, h, nkv)

    q_spec = pl.BlockSpec((1, tq, D), lambda b, qb, hi, kv: (b, qb, 0))
    kv_spec = pl.BlockSpec((1, tkv, D), lambda b, qb, hi, kv: (b, kv, 0))
    w_in_spec = pl.BlockSpec((D, d_k), lambda b, qb, hi, kv: (0, hi))   # per-head cols
    b_in_spec = pl.BlockSpec((1, d_k), lambda b, qb, hi, kv: (0, hi))
    wo_spec = pl.BlockSpec((d_k, D), lambda b, qb, hi, kv: (hi, 0))     # per-head rows
    bo_spec = pl.BlockSpec((1, D), lambda b, qb, hi, kv: (0, 0))
    out_spec = pl.BlockSpec((1, tq, D), lambda b, qb, hi, kv: (b, qb, 0))

    return pl.pallas_call(
        mha_flash_kernel,
        out_shape=jax.ShapeDtypeStruct((B, S, D), jnp.float32),
        grid=grid,
        in_specs=[q_spec, kv_spec, kv_spec,
                  w_in_spec, b_in_spec, w_in_spec, b_in_spec, w_in_spec, b_in_spec,
                  wo_spec, bo_spec],
        out_specs=out_spec,
        scratch_shapes=[
            pltpu.VMEM((tq, d_k), jnp.float32),   # projected + pre-scaled Q head block
            pltpu.VMEM((tq, 1), jnp.float32),     # running row max
            pltpu.VMEM((tq, 1), jnp.float32),     # running softmax denominator
            pltpu.VMEM((tq, d_k), jnp.float32),   # running context numerator
            pltpu.VMEM((tq, D), jnp.float32),     # output-projection accumulator
        ],
        compiler_params=pltpu.CompilerParams(
            dimension_semantics=("parallel", "parallel", "arbitrary", "arbitrary"),
            vmem_limit_bytes=32 * 1024 * 1024),
    )(q, k, v, wq, bq, wk, bk, wv, bv, wo, bo)


def _init_linear(key, d_in, d_out):
    # Deterministic, nn.Linear-like init: U(-1/sqrt(d_in), 1/sqrt(d_in)).
    kw, kb = jax.random.split(key)
    bound = 1.0 / math.sqrt(d_in)
    w = jax.random.uniform(kw, (d_in, d_out), jnp.float32, -bound, bound)  # (in, out)
    b = jax.random.uniform(kb, (1, d_out), jnp.float32, -bound, bound)
    return w, b


def _reference(q, k, v, params, *, h):
    # Pure-JAX reference of the (intended) forward pass, for verification.
    B, S, D = q.shape
    d_k = D // h
    wq, bq, wk, bk, wv, bv, wo, bo = params
    Q = q @ wq + bq
    K = k @ wk + bk
    V = v @ wv + bv
    Q = Q.reshape(B, S, h, d_k).transpose(0, 2, 1, 3)
    K = K.reshape(B, S, h, d_k).transpose(0, 2, 1, 3)
    V = V.reshape(B, S, h, d_k).transpose(0, 2, 1, 3)
    s = jnp.einsum("bhqd,bhkd->bhqk", Q, K) / math.sqrt(d_k)
    p = jax.nn.softmax(s, axis=-1)
    x = jnp.einsum("bhqk,bhkd->bhqd", p, V)
    x = x.transpose(0, 2, 1, 3).reshape(B, S, D)
    return x @ wo + bo


def _run_case(key, B, S, d_model, h, tq=None, tkv=None):
    kq, kk, kv_, k1, k2, k3, k4 = jax.random.split(key, 7)
    q = jax.random.normal(kq, (B, S, d_model), jnp.float32)
    k = jax.random.normal(kk, (B, S, d_model), jnp.float32)
    v = jax.random.normal(kv_, (B, S, d_model), jnp.float32)
    params = (*_init_linear(k1, d_model, d_model),   # w_q, b_q
              *_init_linear(k2, d_model, d_model),   # w_k, b_k
              *_init_linear(k3, d_model, d_model),   # w_v, b_v
              *_init_linear(k4, d_model, d_model))   # w_o, b_o

    out = multi_head_attention(q, k, v, params, h=h, tq=tq, tkv=tkv)
    out = jax.block_until_ready(out)

    ref = _reference(q, k, v, params, h=h)
    assert out.shape == (B, S, d_model)
    # Tolerance relaxed vs the exact f32 reference because the softmax
    # normalization uses the EUP approximate reciprocal (pl.reciprocal(approx=True)).
    assert jnp.allclose(out, ref, atol=1e-2, rtol=1e-2), "mismatch vs JAX reference"


if __name__ == "__main__":
    # Small demo shapes. d_model=256, h=2 gives d_k=128, i.e. lane-dense head
    # tiles (the per-head weight BlockSpec slices are 128 lanes wide).
    # dropout_p = 0.0 (identity dropout / eval mode) -> deterministic output.
    key = jax.random.PRNGKey(0)
    key_a, key_b = jax.random.split(key)

    # Case 1: single q/kv block (whole sequence in one tile).
    _run_case(key_a, B=2, S=8, d_model=256, h=2)

    # Case 2: multi-block path — exercises the online-softmax reduction across
    # kv tiles and the per-head output-projection accumulation across q tiles.
    _run_case(key_b, B=2, S=256, d_model=256, h=2, tq=128, tkv=128)

    print("KERNEL_OK")
</pallas_src>

<mosaic_0001>
module attributes {stable_mosaic.version = 11 : i64} {
  func.func @mha_flash_kernel(%arg0: i32, %arg1: i32, %arg2: i32, %arg3: i32, %arg4: memref<1x8x256xf32, #tpu.memory_space<vmem>>, %arg5: memref<1x8x256xf32, #tpu.memory_space<vmem>>, %arg6: memref<1x8x256xf32, #tpu.memory_space<vmem>>, %arg7: memref<256x128xf32, #tpu.memory_space<vmem>>, %arg8: memref<1x128xf32, #tpu.memory_space<vmem>>, %arg9: memref<256x128xf32, #tpu.memory_space<vmem>>, %arg10: memref<1x128xf32, #tpu.memory_space<vmem>>, %arg11: memref<256x128xf32, #tpu.memory_space<vmem>>, %arg12: memref<1x128xf32, #tpu.memory_space<vmem>>, %arg13: memref<128x256xf32, #tpu.memory_space<vmem>>, %arg14: memref<1x256xf32, #tpu.memory_space<vmem>>, %arg15: memref<1x8x256xf32, #tpu.memory_space<vmem>>, %arg16: memref<8x128xf32, #tpu.memory_space<vmem>>, %arg17: memref<8x1xf32, #tpu.memory_space<vmem>>, %arg18: memref<8x1xf32, #tpu.memory_space<vmem>>, %arg19: memref<8x128xf32, #tpu.memory_space<vmem>>, %arg20: memref<8x256xf32, #tpu.memory_space<vmem>>) attributes {dimension_semantics = [#tpu.dimension_semantics<parallel>, #tpu.dimension_semantics<parallel>, #tpu.dimension_semantics<arbitrary>, #tpu.dimension_semantics<arbitrary>], iteration_bounds = array<i64: 2, 1, 2, 1>, scalar_prefetch = 0 : i64, scratch_operands = 5 : i64, tpu.core_type = #tpu.core_type<tc>, window_params = [{transform_indices = @transform_0, window_bounds = array<i64: 1, 8, 256>}, {transform_indices = @transform_1, window_bounds = array<i64: 1, 8, 256>}, {transform_indices = @transform_2, window_bounds = array<i64: 1, 8, 256>}, {transform_indices = @transform_3, window_bounds = array<i64: 256, 128>}, {transform_indices = @transform_4, window_bounds = array<i64: 1, 128>}, {transform_indices = @transform_5, window_bounds = array<i64: 256, 128>}, {transform_indices = @transform_6, window_bounds = array<i64: 1, 128>}, {transform_indices = @transform_7, window_bounds = array<i64: 256, 128>}, {transform_indices = @transform_8, window_bounds = array<i64: 1, 128>}, {transform_indices = @transform_9, window_bounds = array<i64: 128, 256>}, {pipeline_mode = #tpu.pipeline_mode<synchronous>, transform_indices = @transform_10, window_bounds = array<i64: 1, 256>}, {transform_indices = @transform_11, window_bounds = array<i64: 1, 8, 256>}]} {
    %c0_i32 = arith.constant 0 : i32
    %0 = arith.cmpi eq, %arg2, %c0_i32 : i32
    %c0_i32_0 = arith.constant 0 : i32
    %1 = arith.cmpi eq, %arg3, %c0_i32_0 : i32
    %2 = arith.andi %0, %1 : i1
    %3 = arith.extui %2 : i1 to i32
    %c0_i32_1 = arith.constant 0 : i32
    %4 = arith.cmpi ne, %3, %c0_i32_1 : i32
    scf.if %4 {
      %cst_42 = arith.constant 0.000000e+00 : f32
      %55 = vector.broadcast %cst_42 : f32 to vector<8x256xf32>
      %c0_43 = arith.constant 0 : index
      %c0_44 = arith.constant 0 : index
      %56 = vector.load %arg20[%c0_43, %c0_44] : memref<8x256xf32, #tpu.memory_space<vmem>>, vector<8x256xf32>
      tpu.vector_store %arg20[%c0_43, %c0_44], %55 {strides = array<i32>} : memref<8x256xf32, #tpu.memory_space<vmem>>, vector<8x256xf32>,
    } else {
    }
    %c0_i32_2 = arith.constant 0 : i32
    %5 = arith.cmpi eq, %arg3, %c0_i32_2 : i32
    %6 = arith.extui %5 : i1 to i32
    %c0_i32_3 = arith.constant 0 : i32
    %7 = arith.cmpi ne, %6, %c0_i32_3 : i32
    scf.if %7 {
      %c0_42 = arith.constant 0 : index
      %c0_43 = arith.constant 0 : index
      %c0_44 = arith.constant 0 : index
      %55 = vector.load %arg4[%c0_42, %c0_43, %c0_44] : memref<1x8x256xf32, #tpu.memory_space<vmem>>, vector<1x8x256xf32>
      %56 = vector.shape_cast %55 : vector<1x8x256xf32> to vector<8x256xf32>
      %c0_45 = arith.constant 0 : index
      %c0_46 = arith.constant 0 : index
      %57 = vector.load %arg7[%c0_45, %c0_46] : memref<256x128xf32, #tpu.memory_space<vmem>>, vector<256x128xf32>
      %cst_47 = arith.constant dense<0.000000e+00> : vector<8x128xf32>
      %58 = tpu.matmul %56, %57, %cst_47 {dimension_numbers = #tpu.dot_dimension_numbers<[1], [0], [0], [1], [0, 0, 1, 1], [], []>} : vector<8x256xf32>, vector<256x128xf32>, vector<8x128xf32> -> vector<8x128xf32>
      %c0_48 = arith.constant 0 : index
      %c0_49 = arith.constant 0 : index
      %59 = vector.load %arg8[%c0_48, %c0_49] : memref<1x128xf32, #tpu.memory_space<vmem>>, vector<1x128xf32>
      %60 = vector.broadcast %59 : vector<1x128xf32> to vector<8x128xf32>
      %61 = arith.addf %58, %60 : vector<8x128xf32>
      %c0_50 = arith.constant 0 : index
      %c0_51 = arith.constant 0 : index
      %62 = vector.load %arg16[%c0_50, %c0_51] : memref<8x128xf32, #tpu.memory_space<vmem>>, vector<8x128xf32>
      tpu.vector_store %arg16[%c0_50, %c0_51], %61 {strides = array<i32>} : memref<8x128xf32, #tpu.memory_space<vmem>>, vector<8x128xf32>,
      %cst_52 = arith.constant 0xFF800000 : f32
      %63 = vector.broadcast %cst_52 : f32 to vector<8x1xf32>
      %c0_53 = arith.constant 0 : index
      %c0_54 = arith.constant 0 : index
      %64 = vector.load %arg17[%c0_53, %c0_54] : memref<8x1xf32, #tpu.memory_space<vmem>>, vector<8x1xf32>
      tpu.vector_store %arg17[%c0_53, %c0_54], %63 {strides = array<i32>} : memref<8x1xf32, #tpu.memory_space<vmem>>, vector<8x1xf32>,
      %cst_55 = arith.constant 0.000000e+00 : f32
      %65 = vector.broadcast %cst_55 : f32 to vector<8x1xf32>
      %c0_56 = arith.constant 0 : index
      %c0_57 = arith.constant 0 : index
      %66 = vector.load %arg18[%c0_56, %c0_57] : memref<8x1xf32, #tpu.memory_space<vmem>>, vector<8x1xf32>
      tpu.vector_store %arg18[%c0_56, %c0_57], %65 {strides = array<i32>} : memref<8x1xf32, #tpu.memory_space<vmem>>, vector<8x1xf32>,
      %cst_58 = arith.constant 0.000000e+00 : f32
      %67 = vector.broadcast %cst_58 : f32 to vector<8x128xf32>
      %c0_59 = arith.constant 0 : index
      %c0_60 = arith.constant 0 : index
      %68 = vector.load %arg19[%c0_59, %c0_60] : memref<8x128xf32, #tpu.memory_space<vmem>>, vector<8x128xf32>
      tpu.vector_store %arg19[%c0_59, %c0_60], %67 {strides = array<i32>} : memref<8x128xf32, #tpu.memory_space<vmem>>, vector<8x128xf32>,
    } else {
    }
    %c0 = arith.constant 0 : index
    %c0_4 = arith.constant 0 : index
    %c0_5 = arith.constant 0 : index
    %8 = vector.load %arg5[%c0, %c0_4, %c0_5] : memref<1x8x256xf32, #tpu.memory_space<vmem>>, vector<1x8x256xf32>
    %9 = vector.shape_cast %8 : vector<1x8x256xf32> to vector<8x256xf32>
    %c0_6 = arith.constant 0 : index
    %c0_7 = arith.constant 0 : index
    %10 = vector.load %arg9[%c0_6, %c0_7] : memref<256x128xf32, #tpu.memory_space<vmem>>, vector<256x128xf32>
    %cst = arith.constant dense<0.000000e+00> : vector<8x128xf32>
    %11 = tpu.matmul %9, %10, %cst {dimension_numbers = #tpu.dot_dimension_numbers<[1], [0], [0], [1], [0, 0, 1, 1], [], []>} : vector<8x256xf32>, vector<256x128xf32>, vector<8x128xf32> -> vector<8x128xf32>
    %c0_8 = arith.constant 0 : index
    %c0_9 = arith.constant 0 : index
    %12 = vector.load %arg10[%c0_8, %c0_9] : memref<1x128xf32, #tpu.memory_space<vmem>>, vector<1x128xf32>
    %13 = vector.broadcast %12 : vector<1x128xf32> to vector<8x128xf32>
    %14 = arith.addf %11, %13 : vector<8x128xf32>
    %c0_10 = arith.constant 0 : index
    %c0_11 = arith.constant 0 : index
    %c0_12 = arith.constant 0 : index
    %15 = vector.load %arg6[%c0_10, %c0_11, %c0_12] : memref<1x8x256xf32, #tpu.memory_space<vmem>>, vector<1x8x256xf32>
    %16 = vector.shape_cast %15 : vector<1x8x256xf32> to vector<8x256xf32>
    %c0_13 = arith.constant 0 : index
    %c0_14 = arith.constant 0 : index
    %17 = vector.load %arg11[%c0_13, %c0_14] : memref<256x128xf32, #tpu.memory_space<vmem>>, vector<256x128xf32>
    %cst_15 = arith.constant dense<0.000000e+00> : vector<8x128xf32>
    %18 = tpu.matmul %16, %17, %cst_15 {dimension_numbers = #tpu.dot_dimension_numbers<[1], [0], [0], [1], [0, 0, 1, 1], [], []>} : vector<8x256xf32>, vector<256x128xf32>, vector<8x128xf32> -> vector<8x128xf32>
    %c0_16 = arith.constant 0 : index
    %c0_17 = arith.constant 0 : index
    %19 = vector.load %arg12[%c0_16, %c0_17] : memref<1x128xf32, #tpu.memory_space<vmem>>, vector<1x128xf32>
    %20 = vector.broadcast %19 : vector<1x128xf32> to vector<8x128xf32>
    %21 = arith.addf %18, %20 : vector<8x128xf32>
    %c0_18 = arith.constant 0 : index
    %c0_19 = arith.constant 0 : index
    %22 = vector.load %arg16[%c0_18, %c0_19] : memref<8x128xf32, #tpu.memory_space<vmem>>, vector<8x128xf32>
    %cst_20 = arith.constant dense<0.000000e+00> : vector<8x8xf32>
    %23 = tpu.matmul %22, %14, %cst_20 {dimension_numbers = #tpu.dot_dimension_numbers<[1], [1], [0], [0], [0, 0, 1, 0], [], []>} : vector<8x128xf32>, vector<8x128xf32>, vector<8x8xf32> -> vector<8x8xf32>
    %c0_21 = arith.constant 0 : index
    %c0_22 = arith.constant 0 : index
    %24 = vector.load %arg17[%c0_21, %c0_22] : memref<8x1xf32, #tpu.memory_space<vmem>>, vector<8x1xf32>
    %cst_23 = arith.constant dense<0xFF800000> : vector<8xf32>
    %25 = vector.multi_reduction <maximumf>, %23, %cst_23 [1] : vector<8x8xf32> to vector<8xf32>
    %26 = vector.shape_cast %25 : vector<8xf32> to vector<8x1xf32>
    %27 = arith.maximumf %24, %26 : vector<8x1xf32>
    %c0_24 = arith.constant 0 : index
    %c0_25 = arith.constant 0 : index
    %28 = vector.load %arg17[%c0_24, %c0_25] : memref<8x1xf32, #tpu.memory_space<vmem>>, vector<8x1xf32>
    %29 = arith.subf %28, %27 : vector<8x1xf32>
    %30 = math.exp %29 : vector<8x1xf32>
    %31 = vector.broadcast %27 : vector<8x1xf32> to vector<8x8xf32>
    %32 = arith.subf %23, %31 : vector<8x8xf32>
    %33 = math.exp %32 : vector<8x8xf32>
    %c0_26 = arith.constant 0 : index
    %c0_27 = arith.constant 0 : index
    %34 = vector.load %arg18[%c0_26, %c0_27] : memref<8x1xf32, #tpu.memory_space<vmem>>, vector<8x1xf32>
    %35 = arith.mulf %30, %34 : vector<8x1xf32>
    %cst_28 = arith.constant dense<0.000000e+00> : vector<8xf32>
    %36 = vector.multi_reduction <add>, %33, %cst_28 [1] : vector<8x8xf32> to vector<8xf32>
    %37 = vector.shape_cast %36 : vector<8xf32> to vector<8x1xf32>
    %38 = arith.addf %35, %37 : vector<8x1xf32>
    %c0_29 = arith.constant 0 : index
    %c0_30 = arith.constant 0 : index
    %39 = vector.load %arg18[%c0_29, %c0_30] : memref<8x1xf32, #tpu.memory_space<vmem>>, vector<8x1xf32>
    tpu.vector_store %arg18[%c0_29, %c0_30], %38 {strides = array<i32>} : memref<8x1xf32, #tpu.memory_space<vmem>>, vector<8x1xf32>,
    %c0_31 = arith.constant 0 : index
    %c0_32 = arith.constant 0 : index
    %40 = vector.load %arg19[%c0_31, %c0_32] : memref<8x128xf32, #tpu.memory_space<vmem>>, vector<8x128xf32>
    %41 = vector.broadcast %30 : vector<8x1xf32> to vector<8x128xf32>
    %42 = arith.mulf %41, %40 : vector<8x128xf32>
    %cst_33 = arith.constant dense<0.000000e+00> : vector<8x128xf32>
    %43 = tpu.matmul %33, %21, %cst_33 {dimension_numbers = #tpu.dot_dimension_numbers<[1], [0], [0], [1], [0, 0, 1, 1], [], []>} : vector<8x8xf32>, vector<8x128xf32>, vector<8x128xf32> -> vector<8x128xf32>
    %44 = arith.addf %42, %43 : vector<8x128xf32>
    %c0_34 = arith.constant 0 : index
    %c0_35 = arith.constant 0 : index
    %45 = vector.load %arg19[%c0_34, %c0_35] : memref<8x128xf32, #tpu.memory_space<vmem>>, vector<8x128xf32>
    tpu.vector_store %arg19[%c0_34, %c0_35], %44 {strides = array<i32>} : memref<8x128xf32, #tpu.memory_space<vmem>>, vector<8x128xf32>,
    %c0_36 = arith.constant 0 : index
    %c0_37 = arith.constant 0 : index
    %46 = vector.load %arg17[%c0_36, %c0_37] : memref<8x1xf32, #tpu.memory_space<vmem>>, vector<8x1xf32>
    tpu.vector_store %arg17[%c0_36, %c0_37], %27 {strides = array<i32>} : memref<8x1xf32, #tpu.memory_space<vmem>>, vector<8x1xf32>,
    %c0_i32_38 = arith.constant 0 : i32
    %47 = arith.cmpi eq, %arg3, %c0_i32_38 : i32
    %48 = arith.extui %47 : i1 to i32
    %c0_i32_39 = arith.constant 0 : i32
    %49 = arith.cmpi ne, %48, %c0_i32_39 : i32
    scf.if %49 {
      %c0_42 = arith.constant 0 : index
      %c0_43 = arith.constant 0 : index
      %55 = vector.load %arg19[%c0_42, %c0_43] : memref<8x128xf32, #tpu.memory_space<vmem>>, vector<8x128xf32>
      %c0_44 = arith.constant 0 : index
      %c0_45 = arith.constant 0 : index
      %56 = vector.load %arg18[%c0_44, %c0_45] : memref<8x1xf32, #tpu.memory_space<vmem>>, vector<8x1xf32>
      %57 = tpu.reciprocal %56 {approx = true} : vector<8x1xf32> -> vector<8x1xf32>
      %58 = vector.broadcast %57 : vector<8x1xf32> to vector<8x128xf32>
      %59 = arith.mulf %55, %58 : vector<8x128xf32>
      %c0_46 = arith.constant 0 : index
      %c0_47 = arith.constant 0 : index
      %60 = vector.load %arg20[%c0_46, %c0_47] : memref<8x256xf32, #tpu.memory_space<vmem>>, vector<8x256xf32>
      %c0_48 = arith.constant 0 : index
      %c0_49 = arith.constant 0 : index
      %61 = vector.load %arg13[%c0_48, %c0_49] : memref<128x256xf32, #tpu.memory_space<vmem>>, vector<128x256xf32>
      %cst_50 = arith.constant dense<0.000000e+00> : vector<8x256xf32>
      %62 = tpu.matmul %59, %61, %cst_50 {dimension_numbers = #tpu.dot_dimension_numbers<[1], [0], [0], [1], [0, 0, 1, 1], [], []>} : vector<8x128xf32>, vector<128x256xf32>, vector<8x256xf32> -> vector<8x256xf32>
      %63 = arith.addf %60, %62 : vector<8x256xf32>
      %c0_51 = arith.constant 0 : index
      %c0_52 = arith.constant 0 : index
      %64 = vector.load %arg20[%c0_51, %c0_52] : memref<8x256xf32, #tpu.memory_space<vmem>>, vector<8x256xf32>
      tpu.vector_store %arg20[%c0_51, %c0_52], %63 {strides = array<i32>} : memref<8x256xf32, #tpu.memory_space<vmem>>, vector<8x256xf32>,
    } else {
    }
    %c1_i32 = arith.constant 1 : i32
    %50 = arith.cmpi eq, %arg2, %c1_i32 : i32
    %c0_i32_40 = arith.constant 0 : i32
    %51 = arith.cmpi eq, %arg3, %c0_i32_40 : i32
    %52 = arith.andi %50, %51 : i1
    %53 = arith.extui %52 : i1 to i32
    %c0_i32_41 = arith.constant 0 : i32
    %54 = arith.cmpi ne, %53, %c0_i32_41 : i32
    scf.if %54 {
      %c0_42 = arith.constant 0 : index
      %c0_43 = arith.constant 0 : index
      %55 = vector.load %arg20[%c0_42, %c0_43] : memref<8x256xf32, #tpu.memory_space<vmem>>, vector<8x256xf32>
      %c0_44 = arith.constant 0 : index
      %c0_45 = arith.constant 0 : index
      %56 = vector.load %arg14[%c0_44, %c0_45] : memref<1x256xf32, #tpu.memory_space<vmem>>, vector<1x256xf32>
      %57 = vector.broadcast %56 : vector<1x256xf32> to vector<8x256xf32>
      %58 = arith.addf %55, %57 : vector<8x256xf32>
      %c0_46 = arith.constant 0 : index
      %c0_47 = arith.constant 0 : index
      %c0_48 = arith.constant 0 : index
      %59 = vector.load %arg15[%c0_46, %c0_47, %c0_48] : memref<1x8x256xf32, #tpu.memory_space<vmem>>, vector<1x8x256xf32>
      %60 = vector.shape_cast %59 : vector<1x8x256xf32> to vector<8x256xf32>
      %61 = vector.shape_cast %58 : vector<8x256xf32> to vector<1x8x256xf32>
      tpu.vector_store %arg15[%c0_46, %c0_47, %c0_48], %61 {strides = array<i32>} : memref<1x8x256xf32, #tpu.memory_space<vmem>>, vector<1x8x256xf32>,
    } else {
    }
    return
  }
  func.func @transform_0(%arg0: i32, %arg1: i32, %arg2: i32, %arg3: i32) -> (i32, i32, i32) {
    %c0_i32 = arith.constant 0 : i32
    %c0_i32_0 = arith.constant 0 : i32
    return %arg0, %arg1, %c0_i32 : i32, i32, i32
  }
  func.func @transform_1(%arg0: i32, %arg1: i32, %arg2: i32, %arg3: i32) -> (i32, i32, i32) {
    %c0_i32 = arith.constant 0 : i32
    %c0_i32_0 = arith.constant 0 : i32
    return %arg0, %arg3, %c0_i32 : i32, i32, i32
  }
  func.func @transform_2(%arg0: i32, %arg1: i32, %arg2: i32, %arg3: i32) -> (i32, i32, i32) {
    %c0_i32 = arith.constant 0 : i32
    %c0_i32_0 = arith.constant 0 : i32
    return %arg0, %arg3, %c0_i32 : i32, i32, i32
  }
  func.func @transform_3(%arg0: i32, %arg1: i32, %arg2: i32, %arg3: i32) -> (i32, i32) {
    %c0_i32 = arith.constant 0 : i32
    %c0_i32_0 = arith.constant 0 : i32
    return %c0_i32, %arg2 : i32, i32
  }
  func.func @transform_4(%arg0: i32, %arg1: i32, %arg2: i32, %arg3: i32) -> (i32, i32) {
    %c0_i32 = arith.constant 0 : i32
    %c0_i32_0 = arith.constant 0 : i32
    return %c0_i32, %arg2 : i32, i32
  }
  func.func @transform_5(%arg0: i32, %arg1: i32, %arg2: i32, %arg3: i32) -> (i32, i32) {
    %c0_i32 = arith.constant 0 : i32
    %c0_i32_0 = arith.constant 0 : i32
    return %c0_i32, %arg2 : i32, i32
  }
  func.func @transform_6(%arg0: i32, %arg1: i32, %arg2: i32, %arg3: i32) -> (i32, i32) {
    %c0_i32 = arith.constant 0 : i32
    %c0_i32_0 = arith.constant 0 : i32
    return %c0_i32, %arg2 : i32, i32
  }
  func.func @transform_7(%arg0: i32, %arg1: i32, %arg2: i32, %arg3: i32) -> (i32, i32) {
    %c0_i32 = arith.constant 0 : i32
    %c0_i32_0 = arith.constant 0 : i32
    return %c0_i32, %arg2 : i32, i32
  }
  func.func @transform_8(%arg0: i32, %arg1: i32, %arg2: i32, %arg3: i32) -> (i32, i32) {
    %c0_i32 = arith.constant 0 : i32
    %c0_i32_0 = arith.constant 0 : i32
    return %c0_i32, %arg2 : i32, i32
  }
  func.func @transform_9(%arg0: i32, %arg1: i32, %arg2: i32, %arg3: i32) -> (i32, i32) {
    %c0_i32 = arith.constant 0 : i32
    %c0_i32_0 = arith.constant 0 : i32
    return %arg2, %c0_i32 : i32, i32
  }
  func.func @transform_10(%arg0: i32, %arg1: i32, %arg2: i32, %arg3: i32) -> (i32, i32) {
    %c0_i32 = arith.constant 0 : i32
    %c0_i32_0 = arith.constant 0 : i32
    %c0_i32_1 = arith.constant 0 : i32
    return %c0_i32, %c0_i32_0 : i32, i32
  }
  func.func @transform_11(%arg0: i32, %arg1: i32, %arg2: i32, %arg3: i32) -> (i32, i32, i32) {
    %c0_i32 = arith.constant 0 : i32
    %c0_i32_0 = arith.constant 0 : i32
    return %arg0, %arg1, %c0_i32 : i32, i32, i32
  }
}

</mosaic_0001>

<bundles_post_ra>
// kernel: tpu_custom_call.1
= control target key start
LH: loop header
LB: loop body
LE: loop exit
PB: predicated region body
PF: predicated region fallthrough
CT: control target
= control target key end

     0   :  { %s3228_s0 = inlined_call_operand.hbm [shape: f32[2,8,256], index: 0, kind: input, shape index: {}]   ;;  %s3229_s1 = inlined_call_operand.hbm [shape: f32[2,8,256], index: 1, kind: input, shape index: {}]   ;;  %s3230_s2 = inlined_call_operand.hbm [shape: f32[2,8,256], index: 2, kind: input, shape index: {}]   ;;  %s3231_s3 = inlined_call_operand.hbm [shape: f32[256,256], index: 3, kind: input, shape index: {}]   ;;  %s3232_s4 = inlined_call_operand.vmem [shape: f32[1,256], index: 4, kind: input, shape index: {}]   ;;  %s3233_s5 = inlined_call_operand.hbm [shape: f32[256,256], index: 5, kind: input, shape index: {}]   ;;  %s3234_s6 = inlined_call_operand.vmem [shape: f32[1,256], index: 6, kind: input, shape index: {}]   ;;  %s3235_s7 = inlined_call_operand.hbm [shape: f32[256,256], index: 7, kind: input, shape index: {}]   ;;  %s3236_s8 = inlined_call_operand.vmem [shape: f32[1,256], index: 8, kind: input, shape index: {}]   ;;  %s3237_s9 = inlined_call_operand.hbm [shape: f32[256,256], index: 9, kind: input, shape index: {}]   ;;  %s3238_s10 = inlined_call_operand.vmem [shape: f32[1,256], index: 10, kind: input, shape index: {}]   ;;  %s3239_s11 = inlined_call_operand.hbm [shape: f32[2,8,256], index: 11, kind: output, shape index: {}]  }
   0x1   :  { %3275 = sst [smem:[#allocation41_spill]] %s3229_s1 }
   0x2   :  { %3276 = sst [smem:[#allocation42_spill]] %s3231_s3 }
   0x3   :  { %3277 = sst [smem:[#allocation43_spill]] %s3232_s4 }
   0x4   :  { %3278 = sst [smem:[#allocation44_spill]] %s3234_s6 }
   0x5   :  { %3279 = sst [smem:[#allocation45_spill]] %s3235_s7 }
   0x6   :  { %3280 = sst [smem:[#allocation46_spill]] %s3236_s8 }
   0x7   :  { %3281 = sst [smem:[#allocation47_spill]] %s3238_s10 }
   0x8   :  { %3282 = sst [smem:[#allocation48_spill]] %s3239_s11 }
   0x9   :  { %16 = vsyncpa [#allocation8], 0 }
   0xa   :  { %18 = vsyncpa [#allocation8 + $0x1], 0 }
   0xb   :  { %19 = vsyncpa [#allocation11], 0 }
   0xc   :  { %21 = vsyncpa [#allocation11 + $0x1], 0 }
   0xd   :  { %22 = vsyncpa [#allocation14], 0 }
   0xe   :  { %24 = vsyncpa [#allocation14 + $0x1], 0 }
   0xf   :  { %25 = vsyncpa [#allocation17], 0 }
  0x10   :  { %27 = vsyncpa [#allocation17 + $0x1], 0 }
  0x11   :  { %28 = vsyncpa [#allocation9], 0 }
  0x12   :  { %30 = vsyncpa [#allocation9 + $0x1], 0  ;;  %s2525_s17 = smov 0   ;;  %s2527_s18 = smov 0  }
  0x13   :  { %s2529_s19 = smov 0   ;;  %s2531_s20 = smov 0  }
  0x14   :  { %s2533_s21 = smov 0   ;;  %s2535_s22 = smov 0  }
  0x15   :  { %s2537_s23 = smov 0   ;;  %s2539_s24 = smov 0  }
  0x16   :  { %s2541_s25 = smov 0   ;;  %s2543_s26 = smov 0  }
  0x17   :  { %s2545_s27 = smov 0  }
  0x18 LB: > { %3283 = sst [smem:[#allocation25_spill]] %s2410_s18  ;;  %s2581_s28 = sadd.s32 4294967295, %s2446_s27   ;;  %s2446_s27 = sphi %s2545_s27, %s36_s27   ;;  %s2442_s26 = sphi %s2543_s26, %s3358_s26   ;;  %s2438_s25 = sphi %s2541_s25, %s3363_s25   ;;  %s2434_s24 = sphi %s2539_s24, %s3356_s24   ;;  %s2430_s23 = sphi %s2537_s23, %s3362_s23   ;;  %s2426_s22 = sphi %s2535_s22, %s3361_s22   ;;  %s2422_s21 = sphi %s2533_s21, %s3360_s21   ;;  %s2418_s20 = sphi %s2531_s20, %s3359_s20   ;;  %s2414_s19 = sphi %s2529_s19, %s3354_s19   ;;  %s2410_s18 = sphi %s2527_s18, %s3353_s18   ;;  %s2406_s17 = sphi %s2525_s17, %s3352_s17  }
  0x19   : > { %3284 = sst [smem:[#allocation26_spill]] %s2414_s19  ;;  %s1656_s29 = sadd.s32 4294967294, %s2446_s27  }
  0x1a   : > { %3285 = sst [smem:[#allocation27_spill]] %s2418_s20  ;;  %s54_s30 = sadd.s32 1, %s2438_s25 }
  0x1b   : > { %3286 = sst [smem:[#allocation28_spill]] %s2430_s23  ;;  %s62_s12 = sadd.s32 1, %s2442_s26 }
  0x1c   : > { %3287 = sst [smem:[#allocation29_spill]] %s2434_s24  ;;  %p56_p0 = scmp.ge.s32.totalorder %s54_s30, 2 }
  0x1d   : > { %3288 = sst [smem:[#allocation30_spill]] %s2442_s26  ;;  %s71_s13 = sadd.s32 1, %s2426_s22 }
  0x1e   : > { %3289 = sst [smem:[#allocation31_spill]] %s2446_s27  ;;  %p78_p1 = scmp.ne.s32.totalorder %s2426_s22, %s2422_s21 }
  0x1f   : > { %3290 = sst [smem:[#allocation32_spill]] %s2581_s28  ;;  %p79_p2 = scmp.eq.s32.totalorder %s2446_s27, 0 }
  0x20   : > { %s3365_s30 = smov (%p56_p0, %s54_s30), 0  ;;  %s3367_s12 = smov (!%p56_p0, %s62_s12), %s2442_s26 }
  0x21   : > { %3291 = sst [smem:[#allocation33_spill]] %s3365_s30  ;;  %p2598_p3 = por %p79_p2, %p78_p1 }
  0x22   : > { %p3242_p4 = scmp.ne.s32.totalorder %s2422_s21, %s2418_s20  ;;  %p64_p5 = scmp.ge.s32.totalorder %s3367_s12, 2 }
  0x23   : > { %p85_p6 = scmp.eq.s32.totalorder %s2581_s28, 0  ;;  %s150_s15 = ssub.s32 %s2438_s25, %s3365_s30 }
  0x24   : > { %s153_s16 = sadd.s32 1, %s2414_s19  ;;  %s3369_s12 = smov (%p64_p5, %s3367_s12), 0 }
  0x25   : > { %3293 = sst [smem:[#allocation34_spill]] %s3369_s12  ;;  %p2615_p7 = por %p85_p6, %p3242_p4 }
  0x26   : > { %p151_p8 = scmp.eq.s32.totalorder %s150_s15, 0  ;;  %s66_s24 = ssub.s32 %s2442_s26, %s3369_s12 }
  0x27   : > { %s3294_s11 = scalar_select %p2615_p7, 1, 0 }
  0x28   : > { %p160_p9 = scmp.ne.s32.totalorder %s2414_s19, %s2410_s18  ;;  %p69_p10 = scmp.eq.s32.totalorder %s66_s24, 0 }
  0x29   : > { %3295 = sst [smem:[#allocation35_spill]] %s3294_s11  ;;  %p166_p11 = scmp.ne.s32.totalorder %s2410_s18, %s2406_s17 }
  0x2a   : > { %s2626_s30 = scalar_select %p151_p8, %s2414_s19, %s153_s16  }
  0x2b   : > { %s2629_s10 = scalar_select %p69_p10, %s2426_s22, %s71_s13  }
  0x2c   : > { %3296 = sst [smem:[#allocation36_spill]] %s2626_s30  ;;  %p2633_p12 = por %p160_p9, %p79_p2 }
  0x2d   : > { %3297 = sst [smem:[#allocation37_spill]] %s2629_s10  ;;  %p2639_p13 = por %p166_p11, %p85_p6 }
  0x2e   : > { %s3298_s8 = scalar_select %p2633_p12, 1, 0 }
  0x2f   : > { %s3299_s15 = scalar_select %p2639_p13, 1, 0 }
  0x30   : > { %p369_p0 = scmp.eq.s32.totalorder %s2581_s28, 3  ;;  %p375_p5 = scmp.eq.s32.totalorder %s1656_s29, 3 }
  0x31   : > { %3300 = sst [smem:[#allocation38_spill]] %s3299_s15  ;;  %p3252_p4 = scmp.lt.s32.totalorder %s2446_s27, 4 }
  0x32   : > { %p2648_p7 = por %p369_p0, %p78_p1  ;;  %p3303_p8 = scmp.ne.s32.totalorder %s2422_s21, %s2418_s20 }
  0x33   : > { %s3247_s13 = sand.u32 1, %s2426_s22   ;;  %s2661_s16 = sshll.u32 %s2442_s26, 8 }
  0x34   : > { %s3301_s17 = scalar_select %p2648_p7, 1, 0 }
  0x35   : > { %p2655_p10 = por %p375_p5, %p3303_p8  ;;  %s2665_s12 = sshll.u32 %s3247_s13, 4 }
  0x36   : > { %3302 = sst [smem:[#allocation39_spill]] %s3301_s17  ;;  %p2671_p2 = pnand %p3252_p4, %p2598_p3 }
  0x37   : > { %s3304_s24 = scalar_select %p2655_p10, 1, 0 }
  0x38   : > { %s3306_s29 = scalar_select %p2671_p2, 1, 0 }
  0x39   : > { %3305 = sst [smem:[#allocation40_spill]] %s3304_s24  ;;  %s2676_s10 = sand.u32 1, %s2446_s27  }
  0x3a   : > { %s3307_s1 = sld [smem:[#allocation41_spill]]  ;;  %s423_s14 = scalar_lea.vmem [#allocation10], %s2665_s12 }
  0x3b   : > { %s433_s13 = sshll.u32 %s423_s14, 4  ;;  %p2692_p3 = pneg %p2671_p2  ;;  %s2685_s13 = int_to_ptr.vmem [resolvable:$true] %s433_s13 }
  0x3d   : > { %s3308_s6 = scalar_select %p2692_p3, 1, 0 }
  0x40   : > { %s2682_s26 = scalar_lea.hbm %s3307_s1, %s2661_s16  ;;  %s2107_s4 = scalar_lea.hbm %s3307_s1, 512 }
  0x41   : > { %s2102_s17 = scalar_lea.hbm %s2682_s26, 256  ;;  %p2108_p11 = scmp.lt.u32.totalorder %s2682_s26, %s3307_s1 }
  0x42   : > { %p2103_p1 = scmp.ne.s32.totalorder %s2682_s26, %s2102_s17  ;;  %p2109_p0 = scmp.lt.u32.totalorder %s2107_s4, %s2102_s17 }
  0x43   : > { %p2111_p8 = scmp.lt.u32.totalorder %s2102_s17, %s2682_s26 }
  0x44   : > { %p2105_p6 = pnand %p2692_p3, %p2103_p1  ;;  %p2110_p5 = por %p2109_p0, %p2108_p11 }
  0x46   : > { %p2106_p9 = pneg %p2105_p6  ;;  %p2112_p4 = por %p2111_p8, %p2110_p5 }
  0x48   : > { %p2113_p10 = pnand %p2112_p4, %p2106_p9 }
  0x4a   : > { %2116 = shalt.err (!%p2113_p10)
}
  0x4b   : > { %s2117_s24 = scalar_lea.vmem %s2685_s13, 256  ;;  %s2448_s20 = smov [#allocation10]  }
  0x4c   : > { %p2118_p1 = scmp.ne.s32.totalorder %s2685_s13, %s2117_s24  ;;  %s2122_s30 = sshll.u32 %s2448_s20, 4  ;;  %s2123_s30 = int_to_ptr.vmem [resolvable:$false] %s2122_s30 }
  0x4d   : > { %s2124_s23 = scalar_lea.vmem %s2123_s30, 512  ;;  %p2125_p13 = scmp.lt.s32.totalorder %s2685_s13, %s2123_s30 }
  0x4e   : > { %p2120_p6 = pnand %p2118_p1, %p2692_p3  ;;  %p2126_p12 = scmp.lt.s32.totalorder %s2124_s23, %s2117_s24 }
  0x50   : > { %p2121_p7 = pneg %p2120_p6  ;;  %p2127_p11 = por %p2126_p12, %p2125_p13 }
  0x52   : > { %p2128_p0 = pnand %p2127_p11, %p2121_p7 }
  0x54   : > { %2131 = shalt.err (!%p2128_p0)
}
  0x55   : > { %s3309_s4 = scalar_lea.sflag [#allocation11], %s2676_s10  ;;  %p3310_p4 = scmp.ne.s32.totalorder %s3298_s8, 0 }
  0x56   : > { %1975 = dma.hbm_to_vmem [thread:$0]  (!%p2671_p2), %s2682_s26, 256, %s2685_s13, %s3309_s4  }
  0x57   : > { %p3311_p10 = scmp.lt.s32.totalorder %s2446_s27, 4  ;;  %p1678_p7 = scmp.ge.s32.totalorder %s2446_s27, 1 }
  0x58   : > { %p559_p12 = scmp.lt.s32.totalorder %s2446_s27, 5  ;;  %s463_s24 = sand.u32 1, %s2414_s19  }
  0x59   : > { %p2721_p9 = pnand %p3311_p10, %p3310_p4  ;;  %s2732_s20 = sshll.u32 %s463_s24, 8 }
  0x5a   : > { %p2728_p13 = pnand %p1678_p7, %p559_p12  ;;  %s2735_s30 = sshll.u32 %s2438_s25, 7 }
  0x5b   : > { %s3312_s17 = scalar_select %p2721_p9, 1, 0 }
  0x5c   : > { %s3313_s14 = scalar_select %p2728_p13, 1, 0 }
  0x5d   : > { %s3314_s3 = sld [smem:[#allocation42_spill]]  ;;  %s465_s23 = scalar_lea.vmem [#allocation13], %s2732_s20 }
  0x5e   : > { %s471_s4 = sshll.u32 %s465_s23, 4  ;;  %p2751_p8 = pneg %p2721_p9  ;;  %s2744_s4 = int_to_ptr.vmem [resolvable:$true] %s471_s4 }
  0x60   : > { %s3315_s19 = scalar_select %p2751_p8, 1, 0 }
  0x63   : > { %s2741_s13 = scalar_lea.hbm %s3314_s3, %s2735_s30  ;;  %s2137_s27 = scalar_lea.hbm %s3314_s3, 8192 }
  0x64   : > { %s2132_s24 = scalar_lea.hbm %s2741_s13, 4096  ;;  %p2138_p11 = scmp.lt.u32.totalorder %s2741_s13, %s3314_s3 }
  0x65   : > { %p2133_p5 = scmp.ne.s32.totalorder %s2741_s13, %s2132_s24  ;;  %p2139_p0 = scmp.lt.u32.totalorder %s2137_s27, %s2132_s24 }
  0x66   : > { %p2141_p10 = scmp.lt.u32.totalorder %s2132_s24, %s2741_s13 }
  0x67   : > { %p2135_p1 = pnand %p2751_p8, %p2133_p5  ;;  %p2140_p4 = por %p2139_p0, %p2138_p11 }
  0x69   : > { %p2136_p6 = pneg %p2135_p1  ;;  %p2142_p7 = por %p2141_p10, %p2140_p4 }
  0x6b   : > { %p2143_p12 = pnand %p2142_p7, %p2136_p6 }
  0x6d   : > { %2146 = shalt.err (!%p2143_p12)
}
  0x6e   : > { %s2147_s1 = scalar_lea.vmem %s2744_s4, 4096  ;;  %s2449_s8 = smov [#allocation13]  }
  0x6f   : > { %p2148_p5 = scmp.ne.s32.totalorder %s2744_s4, %s2147_s1  ;;  %s2152_s26 = sshll.u32 %s2449_s8, 4  ;;  %s2153_s26 = int_to_ptr.vmem [resolvable:$false] %s2152_s26 }
  0x70   : > { %s2154_s15 = scalar_lea.vmem %s2153_s26, 8192  ;;  %p2155_p2 = scmp.lt.s32.totalorder %s2744_s4, %s2153_s26 }
  0x71   : > { %p2150_p1 = pnand %p2148_p5, %p2751_p8  ;;  %p2156_p3 = scmp.lt.s32.totalorder %s2154_s15, %s2147_s1 }
  0x73   : > { %p2151_p13 = pneg %p2150_p1  ;;  %p2157_p11 = por %p2156_p3, %p2155_p2 }
  0x75   : > { %p2158_p0 = pnand %p2157_p11, %p2151_p13 }
  0x77   : > { %2161 = shalt.err (!%p2158_p0)
}
  0x78   : > { %s3269_s27 = smov 256   ;;  %s2451_s24 = smov 128  }
  0x79   : > { %s2452_s23 = smov 8   ;;  %s3316_s8 = scalar_lea.sflag [#allocation14], %s2676_s10 }
  0x7a   : > { %1981 = dma.hbm_to_vmem [thread:$0]  (!%p2721_p9), %s2741_s13, 4096, %s2744_s4, %s3316_s8, %s3269_s27, %s2451_s24, %s2452_s23  }
  0x7b   : > { %s3317_s7 = sld [smem:[#allocation45_spill]]  ;;  %s517_s3 = scalar_lea.vmem [#allocation16], %s2732_s20 }
  0x7c   : > { %s523_s18 = sshll.u32 %s517_s3, 4  ;;  %s3268_s28 = scalar_lea.sflag [#allocation17], %s2676_s10  ;;  %s2786_s18 = int_to_ptr.vmem [resolvable:$true] %s523_s18 }
  0x81   : > { %s2783_s15 = scalar_lea.hbm %s3317_s7, %s2735_s30  ;;  %s2167_s8 = scalar_lea.hbm %s3317_s7, 8192 }
  0x82   : > { %s2162_s11 = scalar_lea.hbm %s2783_s15, 4096  ;;  %p2168_p6 = scmp.lt.u32.totalorder %s2783_s15, %s3317_s7 }
  0x83   : > { %p2163_p2 = scmp.ne.s32.totalorder %s2783_s15, %s2162_s11  ;;  %p2169_p4 = scmp.lt.u32.totalorder %s2167_s8, %s2162_s11 }
  0x84   : > { %p2171_p7 = scmp.lt.u32.totalorder %s2162_s11, %s2783_s15 }
  0x85   : > { %p2165_p3 = pnand %p2163_p2, %p2751_p8  ;;  %p2170_p10 = por %p2169_p4, %p2168_p6 }
  0x87   : > { %p2166_p13 = pneg %p2165_p3  ;;  %p2172_p12 = por %p2171_p7, %p2170_p10 }
  0x89   : > { %p2173_p5 = pnand %p2172_p12, %p2166_p13 }
  0x8b   : > { %2176 = shalt.err (!%p2173_p5)
}
  0x8c   : > { %s2177_s3 = scalar_lea.vmem %s2786_s18, 4096  ;;  %s2453_s13 = smov [#allocation16]  }
  0x8d   : > { %p2178_p1 = scmp.ne.s32.totalorder %s2786_s18, %s2177_s3  ;;  %s2182_s4 = sshll.u32 %s2453_s13, 4  ;;  %s2183_s4 = int_to_ptr.vmem [resolvable:$false] %s2182_s4 }
  0x8e   : > { %s2184_s1 = scalar_lea.vmem %s2183_s4, 8192  ;;  %p2185_p2 = scmp.lt.s32.totalorder %s2786_s18, %s2183_s4 }
  0x8f   : > { %p2180_p11 = pnand %p2178_p1, %p2751_p8  ;;  %p2186_p3 = scmp.lt.s32.totalorder %s2184_s1, %s2177_s3 }
  0x91   : > { %p2181_p0 = pneg %p2180_p11  ;;  %p2187_p6 = por %p2186_p3, %p2185_p2 }
  0x93   : > { %p2188_p4 = pnand %p2187_p6, %p2181_p0 }
  0x95   : > { %2191 = shalt.err (!%p2188_p4)
}
  0x96   : > { %1987 = dma.hbm_to_vmem [thread:$0]  (!%p2721_p9), %s2783_s15, 4096, %s2786_s18, %s3268_s28, %s3269_s27, %s2451_s24, %s2452_s23  }
  0x97   : > { %s2819_s26 = scalar_lea.hbm %s3228_s0, %s2661_s16  ;;  %s402_s3 = scalar_lea.vmem [#allocation7], %s2665_s12 }
  0x98   : > { %s412_s13 = sshll.u32 %s402_s3, 4  ;;  %s3318_s4 = sand.u32 1, %s2426_s22   ;;  %s413_s13 = int_to_ptr.vmem [resolvable:$true] %s412_s13 }
  0x99   : > { %s399_s1 = scalar_lea.sflag [#allocation8], %s3318_s4  ;;  %s2192_s7 = scalar_lea.hbm %s2819_s26, 256 }
  0x9a   : > { %p2193_p13 = scmp.ne.s32.totalorder %s2819_s26, %s2192_s7  ;;  %p3319_p10 = scmp.ne.s32.totalorder %s3308_s6, 0 }
  0x9b   : > { %s2197_s11 = scalar_lea.hbm %s3228_s0, 512  ;;  %p2198_p5 = scmp.lt.u32.totalorder %s2819_s26, %s3228_s0 }
  0x9c   : > { %p2195_p7 = pnand %p2193_p13, %p3319_p10  ;;  %p2199_p1 = scmp.lt.u32.totalorder %s2197_s11, %s2192_s7 }
  0x9d   : > { %p2201_p0 = scmp.lt.u32.totalorder %s2192_s7, %s2819_s26 }
  0x9e   : > { %p2196_p12 = pneg %p2195_p7  ;;  %p2200_p11 = por %p2199_p1, %p2198_p5 }
  0xa0   : > { %p2202_p2 = por %p2201_p0, %p2200_p11 }
  0xa2   : > { %p2203_p3 = pnand %p2202_p2, %p2196_p12 }
  0xa4   : > { %2206 = shalt.err (!%p2203_p3)
}
  0xa5   : > { %s2207_s3 = scalar_lea.vmem %s413_s13, 256  ;;  %s2454_s4 = smov [#allocation7]  }
  0xa6   : > { %p2208_p6 = scmp.ne.s32.totalorder %s413_s13, %s2207_s3  ;;  %s2212_s27 = sshll.u32 %s2454_s4, 4  ;;  %s2213_s27 = int_to_ptr.vmem [resolvable:$false] %s2212_s27 }
  0xa7   : > { %s2214_s18 = scalar_lea.vmem %s2213_s27, 512  ;;  %p2215_p7 = scmp.lt.s32.totalorder %s413_s13, %s2213_s27 }
  0xa8   : > { %p2210_p4 = pnand %p2208_p6, %p3319_p10  ;;  %p2216_p9 = scmp.lt.s32.totalorder %s2214_s18, %s2207_s3 }
  0xaa   : > { %p2211_p13 = pneg %p2210_p4  ;;  %p2217_p8 = por %p2216_p9, %p2215_p7 }
  0xac   : > { %p2218_p1 = pnand %p2217_p8, %p2211_p13 }
  0xae   : > { %2221 = shalt.err (!%p2218_p1)
}
  0xaf   : > { %p3320_p5 = scmp.ne.s32.totalorder %s3306_s29, 0  ;;  %s2845_s15 = scalar_lea.hbm %s3230_s2, %s2661_s16 }
  0xb0   : > { %s444_s27 = scalar_lea.vmem [#allocation12], %s2665_s12  ;;  %s2222_s8 = scalar_lea.hbm %s2845_s15, 256 }
  0xb1   : > { %1972 = dma.hbm_to_vmem [thread:$0]  (!%p3320_p5), %s2819_s26, 256, %s413_s13, %s399_s1  }
  0xb2   : > { %s454_s11 = sshll.u32 %s444_s27, 4  ;;  %p2223_p9 = scmp.ne.s32.totalorder %s2845_s15, %s2222_s8  ;;  %s455_s11 = int_to_ptr.vmem [resolvable:$true] %s454_s11 }
  0xb3   : > { %s2227_s26 = scalar_lea.hbm %s3230_s2, 512  ;;  %p2228_p11 = scmp.lt.u32.totalorder %s2845_s15, %s3230_s2 }
  0xb4   : > { %p2225_p8 = pnand %p2223_p9, %p3319_p10  ;;  %p2229_p0 = scmp.lt.u32.totalorder %s2227_s26, %s2222_s8 }
  0xb5   : > { %p2231_p3 = scmp.lt.u32.totalorder %s2222_s8, %s2845_s15 }
  0xb6   : > { %p2226_p12 = pneg %p2225_p8  ;;  %p2230_p2 = por %p2229_p0, %p2228_p11 }
  0xb8   : > { %p2232_p6 = por %p2231_p3, %p2230_p2 }
  0xba   : > { %p2233_p4 = pnand %p2232_p6, %p2226_p12 }
  0xbc   : > { %2236 = shalt.err (!%p2233_p4)
}
  0xbd   : > { %s2237_s12 = scalar_lea.vmem %s455_s11, 256  ;;  %s2455_s16 = smov [#allocation12]  }
  0xbe   : > { %p2238_p13 = scmp.ne.s32.totalorder %s455_s11, %s2237_s12  ;;  %s2242_s18 = sshll.u32 %s2455_s16, 4  ;;  %s2243_s18 = int_to_ptr.vmem [resolvable:$false] %s2242_s18 }
  0xbf   : > { %s2244_s7 = scalar_lea.vmem %s2243_s18, 512  ;;  %p2245_p9 = scmp.lt.s32.totalorder %s455_s11, %s2243_s18 }
  0xc0   : > { %p2240_p7 = pnand %p2238_p13, %p3319_p10  ;;  %p2246_p8 = scmp.lt.s32.totalorder %s2244_s7, %s2237_s12 }
  0xc2   : > { %p2241_p1 = pneg %p2240_p7  ;;  %p2247_p5 = por %p2246_p8, %p2245_p9 }
  0xc4   : > { %p2248_p0 = pnand %p2247_p5, %p2241_p1 }
  0xc6   : > { %2251 = shalt.err (!%p2248_p0)
}
  0xc7   : > { %p3321_p11 = scmp.ne.s32.totalorder %s3306_s29, 0  ;;  %s3322_s28 = scalar_lea.sflag [#allocation11], %s2676_s10 }
  0xc8   : > { %s2871_s8 = scalar_lea.hbm %s3233_s5, %s2735_s30  ;;  %s491_s3 = scalar_lea.vmem [#allocation15], %s2732_s20 }
  0xc9   : > { %1978 = dma.hbm_to_vmem [thread:$0]  (!%p3321_p11), %s2845_s15, 256, %s455_s11, %s3322_s28  }
  0xca   : > { %s497_s4 = sshll.u32 %s491_s3, 4  ;;  %s2252_s29 = scalar_lea.hbm %s2871_s8, 4096  ;;  %s2874_s4 = int_to_ptr.vmem [resolvable:$true] %s497_s4 }
  0xcb   : > { %p2253_p10 = scmp.ne.s32.totalorder %s2871_s8, %s2252_s29  ;;  %p3323_p5 = scmp.ne.s32.totalorder %s3315_s19, 0 }
  0xcc   : > { %s2257_s11 = scalar_lea.hbm %s3233_s5, 8192  ;;  %p2258_p3 = scmp.lt.u32.totalorder %s2871_s8, %s3233_s5 }
  0xcd   : > { %p2255_p12 = pnand %p2253_p10, %p3323_p5  ;;  %p2259_p6 = scmp.lt.u32.totalorder %s2257_s11, %s2252_s29 }
  0xce   : > { %p2261_p13 = scmp.lt.u32.totalorder %s2252_s29, %s2871_s8 }
  0xcf   : > { %p2256_p2 = pneg %p2255_p12  ;;  %p2260_p4 = por %p2259_p6, %p2258_p3 }
  0xd1   : > { %p2262_p7 = por %p2261_p13, %p2260_p4 }
  0xd3   : > { %p2263_p1 = pnand %p2262_p7, %p2256_p2 }
  0xd5   : > { %2266 = shalt.err (!%p2263_p1)
}
  0xd6   : > { %s2267_s1 = scalar_lea.vmem %s2874_s4, 4096  ;;  %s2456_s12 = smov [#allocation15]  }
  0xd7   : > { %p2268_p9 = scmp.ne.s32.totalorder %s2874_s4, %s2267_s1  ;;  %s2272_s16 = sshll.u32 %s2456_s12, 4  ;;  %s2273_s16 = int_to_ptr.vmem [resolvable:$false] %s2272_s16 }
  0xd8   : > { %s2274_s18 = scalar_lea.vmem %s2273_s16, 8192  ;;  %p2275_p11 = scmp.lt.s32.totalorder %s2874_s4, %s2273_s16 }
  0xd9   : > { %p2270_p8 = pnand %p2268_p9, %p3323_p5  ;;  %p2276_p10 = scmp.lt.s32.totalorder %s2274_s18, %s2267_s1 }
  0xdb   : > { %p2271_p0 = pneg %p2270_p8  ;;  %p2277_p12 = por %p2276_p10, %p2275_p11 }
  0xdd   : > { %p2278_p3 = pnand %p2277_p12, %p2271_p0 }
  0xdf   : > { %2281 = shalt.err (!%p2278_p3)
}
  0xe0   : > { %p3324_p2 = scmp.ne.s32.totalorder %s3312_s17, 0  ;;  %s3325_s7 = smov 256  }
  0xe1   : > { %s3326_s28 = scalar_lea.sflag [#allocation14], %s2676_s10  ;;  %s1702_s6 = sshll.u32 %s2438_s25, 12 }
  0xe2   : > { %1984 = dma.hbm_to_vmem [thread:$0]  (!%p3324_p2), %s2871_s8, 4096, %s2874_s4, %s3326_s28, %s3325_s7, %s2451_s24, %s2452_s23  }
  0xe3   : > { %s543_s27 = scalar_lea.vmem [#allocation18], %s2732_s20  ;;  %s2907_s15 = scalar_lea.hbm %s3237_s9, %s1702_s6 }
  0xe4   : > { %s551_s3 = sshll.u32 %s543_s27, 4  ;;  %s2282_s11 = scalar_lea.hbm %s2907_s15, 4096  ;;  %s2909_s3 = int_to_ptr.vmem [resolvable:$true] %s551_s3 }
  0xe5   : > { %p2283_p6 = scmp.ne.s32.totalorder %s2907_s15, %s2282_s11  ;;  %s2287_s20 = scalar_lea.hbm %s3237_s9, 8192 }
  0xe6   : > { %p2288_p7 = scmp.lt.u32.totalorder %s2907_s15, %s3237_s9  ;;  %p2289_p1 = scmp.lt.u32.totalorder %s2287_s20, %s2282_s11 }
  0xe7   : > { %p2285_p4 = pnand %p2283_p6, %p3323_p5  ;;  %p2291_p8 = scmp.lt.u32.totalorder %s2282_s11, %s2907_s15 }
  0xe8   : > { %p2290_p9 = por %p2289_p1, %p2288_p7 }
  0xe9   : > { %p2286_p13 = pneg %p2285_p4 }
  0xea   : > { %p2292_p0 = por %p2291_p8, %p2290_p9 }
  0xec   : > { %p2293_p11 = pnand %p2292_p0, %p2286_p13 }
  0xee   : > { %2296 = shalt.err (!%p2293_p11)
}
  0xef   : > { %s2297_s13 = scalar_lea.vmem %s2909_s3, 4096  ;;  %s2457_s30 = smov [#allocation18]  }
  0xf0   : > { %p2298_p10 = scmp.ne.s32.totalorder %s2909_s3, %s2297_s13  ;;  %s2302_s1 = sshll.u32 %s2457_s30, 4  ;;  %s2303_s1 = int_to_ptr.vmem [resolvable:$false] %s2302_s1 }
  0xf1   : > { %s2304_s12 = scalar_lea.vmem %s2303_s1, 8192  ;;  %p2305_p6 = scmp.lt.s32.totalorder %s2909_s3, %s2303_s1 }
  0xf2   : > { %p2300_p12 = pnand %p2298_p10, %p3323_p5  ;;  %p2306_p4 = scmp.lt.s32.totalorder %s2304_s12, %s2297_s13 }
  0xf4   : > { %p2301_p3 = pneg %p2300_p12  ;;  %p2307_p7 = por %p2306_p4, %p2305_p6 }
  0xf6   : > { %p2308_p1 = pnand %p2307_p7, %p2301_p3 }
  0xf8   : > { %2311 = shalt.err (!%p2308_p1)
}
  0xf9   : > { %s2458_s16 = smov 16   ;;  %s3327_s18 = scalar_lea.sflag [#allocation17], %s2676_s10 }
  0xfa   : > { %1990 = dma.hbm_to_vmem [thread:$0]  (!%p3324_p2), %s2907_s15, 4096, %s2909_s3, %s3327_s18, %s3325_s7, %s3325_s7, %s2458_s16  }
  0xfb   : > { %p3328_p5 = scmp.ne.s32.totalorder %s3313_s14, 0 }
  0xfc   : > { %s3329_s19 = sld [smem:[#allocation35_spill]] (!%p3328_p5)  ;;  %s2939_s28 = sand.u32 (!%p3328_p5), 1, %s2422_s21  }
  0xfd   : > { %563 = sbr.rel (%p3328_p5) target bundleno = 1600 (0x640), region = 64  ;;  %s2942_s6 = sshll.u32 (!%p3328_p5), %s2939_s28, 4 }
  0xfe   : > { %s566_s17 = scalar_lea.sflag (!%p3328_p5), [#allocation8], %s2939_s28  ;;  %s569_s27 = scalar_lea.vmem (!%p3328_p5), [#allocation7], %s2942_s6 }
 0x102   : > { %p3330_p13 = scmp.ne.s32.totalorder (!%p3328_p5), %s3329_s19, 0 }
 0x104   : > { %2385 = dma.done.wait (%p3330_p13), %s566_s17, 256  }
 0x105   : > { %2387 = vsyncadd (%p3330_p13), %s566_s17, 4294967040  ;;  %s3331_s10 = sld [smem:[#allocation32_spill]]  ;;  %s578_s3 = scalar_lea.vmem [#allocation10], %s2942_s6 }
 0x10b   : > { %s574_s14 = sand.u32 1, %s3331_s10  }
 0x10c   : > { %s575_s7 = scalar_lea.sflag [#allocation11], %s574_s14 }
 0x10d   : > { %2389 = dma.done.wait (%p3330_p13), %s575_s7, 512  }
 0x10e   : > { %2391 = vsyncadd (%p3330_p13), %s575_s7, 4294966784  ;;  %s3332_s29 = sld [smem:[#allocation25_spill]]  ;;  %s3333_s26 = sld [smem:[#allocation38_spill]] }
 0x10f   : > { %s587_s24 = scalar_lea.vmem [#allocation12], %s2942_s6  ;;  %s593_s23 = scalar_lea.sflag [#allocation14], %s574_s14 }
 0x114   : > { %s594_s15 = sand.u32 1, %s3332_s29   ;;  %p3334_p2 = scmp.ne.s32.totalorder %s3333_s26, 0 }
 0x115   : > { %s1682_s11 = sshll.u32 %s594_s15, 8 }
 0x116   : > { %s2958_s20 = scalar_lea.vmem [#allocation13], %s1682_s11 }
 0x117   : > { %2393 = dma.done.wait (%p3334_p2), %s593_s23, 8192  }
 0x118   : > { %2395 = vsyncadd (%p3334_p2), %s593_s23, 4294959104  ;;  %s2964_s8 = scalar_lea.vmem [#allocation15], %s1682_s11  ;;  %s611_s4 = scalar_lea.sflag [#allocation17], %s574_s14 }
 0x119   : > { %s2966_s13 = scalar_lea.vmem [#allocation16], %s1682_s11 }
 0x11a   : > { %2397 = dma.done.wait (%p3334_p2), %s611_s4, 8192  }
 0x11b   : > { %2399 = vsyncadd (%p3334_p2), %s611_s4, 4294959104  ;;  %s3335_s30 = sld [smem:[#allocation28_spill]]  ;;  %s3336_s16 = sld [smem:[#allocation43_spill]] }
 0x11c   : > { %s3337_s10 = sld [smem:[#allocation44_spill]]  ;;  %s3338_s26 = sld [smem:[#allocation46_spill]] }
 0x11d   : > { %s2989_s23 = scalar_lea.vmem [#allocation18], %s1682_s11  ;;  %s2992_s4 = scalar_lea.vmem [#allocation19], %s2942_s6 }
 0x121   : > { %p701_p9 = scmp.lt.s32.totalorder %s3335_s30, 1  ;;  %p711_p8 = scmp.eq.s32.totalorder %s3335_s30, 0 }
 0x122   : > { %v2459_v0 = vmov (%p711_p8), 0.0  }
 0x123   : > { %s3371_s30 = smov (!%p701_p9, %s3335_s30), 1  ;;  %716 = sbr.rel (!%p711_p8) target bundleno = 298 (0x12a), region = 96 }
 0x124   : > { %s703_s18 = scalar_lea.vmem %s3336_s16, %s3371_s30  ;;  %s706_s14 = scalar_lea.vmem %s3337_s10, %s3371_s30  ;;  %717 = vst [vmem:[#allocation6] sm:$0xff] (%p711_p8), %v2459_v0  ;;  %718 = vst [vmem:[#allocation6 + $0x8] sm:$0xff] (%p711_p8), %v2459_v0 }
 0x125   : > { %s709_s15 = scalar_lea.vmem %s3338_s26, %s3371_s30 }
 0x12a PF: > { %v856_v1 = vld [vmem:[%s2964_s8 + $0x80] sm:$0xff]  ;;  %v857_v2 = vld [vmem:[%s2964_s8 + $0x88] sm:$0xff]  ;;  %v858_v12 = vld [vmem:[%s2964_s8 + $0x90] sm:$0xff]  ;;  %vm2461_vm0 = vmmov 0   ;;  %vm834_vm1 = vcmask 7168   ;;  %vm1132_vm2 = vcmask 64512  }
 0x12b   : > { %v840_v3 = vld [vmem:[%s2964_s8] sm:$0xff]  ;;  %v1857_v4 = vpack.c.bf16 %v857_v2, %v856_v1  ;;  %v841_v5 = vld [vmem:[%s2964_s8 + $0x8] sm:$0xff]  ;;  %v859_v14 = vld [vmem:[%s2964_s8 + $0x98] sm:$0xff]  ;;  %s3342_s30 = sld [smem:[#allocation28_spill]] }
 0x12c   : > { %v740_v6 = vld [vmem:[%s2958_s20 + $0x80] sm:$0xff]  ;;  %v741_v7 = vld [vmem:[%s2958_s20 + $0x88] sm:$0xff]  ;;  %v1859_v8 = vpack.c.bf16 %v841_v5, %v840_v3  ;;  %v842_v15 = vld [vmem:[%s2964_s8 + $0x10] sm:$0xff]  ;;  %v1861_v17 = vpack.c.bf16 %v859_v14, %v858_v12 }
 0x12d   : > { %v1825_v9 = vpack.c.bf16 %v741_v7, %v740_v6  ;;  %v724_v10 = vld [vmem:[%s2958_s20] sm:$0xff]  ;;  %v725_v11 = vld [vmem:[%s2958_s20 + $0x8] sm:$0xff]  ;;  %1858 = vmatprep.subr.bf16.mxu1 %v1857_v4  ;;  %v843_v16 = vld [vmem:[%s2964_s8 + $0x18] sm:$0xff] }
 0x12e   : > { %v1827_v13 = vpack.c.bf16 %v725_v11, %v724_v10  ;;  %1860 = vmatpush3.bf16.msra.mxu1 %v1859_v8  ;;  %v1863_v18 = vpack.c.bf16 %v843_v16, %v842_v15  ;;  %v742_v19 = vld [vmem:[%s2958_s20 + $0x90] sm:$0xff]  ;;  %v743_v20 = vld [vmem:[%s2958_s20 + $0x98] sm:$0xff]  ;;  %v860_v24 = vld [vmem:[%s2964_s8 + $0xa0] sm:$0xff] }
 0x12f   : > { %1826 = vmatprep.subr.bf16.mxu0 %v1825_v9  ;;  %v726_v21 = vld [vmem:[%s2958_s20 + $0x10] sm:$0xff]  ;;  %v1829_v22 = vpack.c.bf16 %v743_v20, %v742_v19  ;;  %v727_v23 = vld [vmem:[%s2958_s20 + $0x18] sm:$0xff]  ;;  %v861_v25 = vld [vmem:[%s2964_s8 + $0xa8] sm:$0xff]  ;;  %1862 = vmatprep.subr.bf16.mxu1 %v1861_v17 }
 0x130   : > { %1828 = vmatpush3.bf16.msra.mxu0 %v1827_v13  ;;  %v1831_v26 = vpack.c.bf16 %v727_v23, %v726_v21  ;;  %v1865_v27 = vpack.c.bf16 %v861_v25, %v860_v24  ;;  %v844_v28 = vld [vmem:[%s2964_s8 + $0x20] sm:$0xff]  ;;  %v845_v29 = vld [vmem:[%s2964_s8 + $0x28] sm:$0xff]  ;;  %v862_v36 = vld [vmem:[%s2964_s8 + $0xb0] sm:$0xff] }
 0x131   : > { %v744_v30 = vld [vmem:[%s2958_s20 + $0xa0] sm:$0xff]  ;;  %1830 = vmatprep.subr.bf16.mxu0 %v1829_v22  ;;  %v745_v31 = vld [vmem:[%s2958_s20 + $0xa8] sm:$0xff]  ;;  %v1867_v34 = vpack.c.bf16 %v845_v29, %v844_v28  ;;  %v863_v37 = vld [vmem:[%s2964_s8 + $0xb8] sm:$0xff]  ;;  %p1360_p0 = scmp.eq.s32.totalorder %s3342_s30, 1 }
 0x132   : > { %v728_v32 = vld [vmem:[%s2958_s20 + $0x20] sm:$0xff]  ;;  %v729_v33 = vld [vmem:[%s2958_s20 + $0x28] sm:$0xff]  ;;  %1864 = vmatpush3.bf16.msra.mxu1 %v1863_v18  ;;  %v1833_v35 = vpack.c.bf16 %v745_v31, %v744_v30  ;;  %v846_v38 = vld [vmem:[%s2964_s8 + $0x30] sm:$0xff]  ;;  %v1869_v40 = vpack.c.bf16 %v863_v37, %v862_v36 }
 0x133   : > { %1866 = vmatprep.subr.bf16.mxu1 %v1865_v27  ;;  %v1835_v39 = vpack.c.bf16 %v729_v33, %v728_v32  ;;  %v847_v41 = vld [vmem:[%s2964_s8 + $0x38] sm:$0xff]  ;;  %v746_v42 = vld [vmem:[%s2958_s20 + $0xb0] sm:$0xff]  ;;  %v864_v47 = vld [vmem:[%s2964_s8 + $0xc0] sm:$0xff] }
 0x134   : > { %1832 = vmatpush3.bf16.msra.mxu0 %v1831_v26  ;;  %v747_v43 = vld [vmem:[%s2958_s20 + $0xb8] sm:$0xff]  ;;  %v730_v45 = vld [vmem:[%s2958_s20 + $0x30] sm:$0xff]  ;;  %v865_v48 = vld [vmem:[%s2964_s8 + $0xc8] sm:$0xff]  ;;  %v1871_v49 = vpack.c.bf16 %v847_v41, %v846_v38 }
 0x135   : > { %1834 = vmatprep.subr.bf16.mxu0 %v1833_v35  ;;  %v1837_v44 = vpack.c.bf16 %v747_v43, %v746_v42  ;;  %v731_v46 = vld [vmem:[%s2958_s20 + $0x38] sm:$0xff]  ;;  %v748_v50 = vld [vmem:[%s2958_s20 + $0xc0] sm:$0xff]  ;;  %v749_v51 = vld [vmem:[%s2958_s20 + $0xc8] sm:$0xff]  ;;  %v1873_v53 = vpack.c.bf16 %v865_v48, %v864_v47 }
 0x136   : > { %1868 = vmatpush3.bf16.msra.mxu1 %v1867_v34  ;;  %v1839_v52 = vpack.c.bf16 %v731_v46, %v730_v45  ;;  %v848_v54 = vld [vmem:[%s2964_s8 + $0x40] sm:$0xff]  ;;  %v849_v55 = vld [vmem:[%s2964_s8 + $0x48] sm:$0xff]  ;;  %v1841_v57 = vpack.c.bf16 %v749_v51, %v748_v50  ;;  %v866_v59 = vld [vmem:[%s2964_s8 + $0xd0] sm:$0xff] }
 0x137   : > { %1870 = vmatprep.subr.bf16.mxu1 %v1869_v40  ;;  %v732_v56 = vld [vmem:[%s2958_s20 + $0x40] sm:$0xff]  ;;  %v733_v58 = vld [vmem:[%s2958_s20 + $0x48] sm:$0xff]  ;;  %v867_v60 = vld [vmem:[%s2964_s8 + $0xd8] sm:$0xff]  ;;  %v1875_v63 = vpack.c.bf16 %v849_v55, %v848_v54 }
 0x138   : > { %1836 = vmatpush3.bf16.msra.mxu0 %v1835_v39  ;;  %v750_v61 = vld [vmem:[%s2958_s20 + $0xd0] sm:$0xff]  ;;  %v751_v62 = vld [vmem:[%s2958_s20 + $0xd8] sm:$0xff]  ;;  %v1843_v0 = vpack.c.bf16 %v733_v58, %v732_v56  ;;  %v1877_v1 = vpack.c.bf16 %v867_v60, %v866_v59  ;;  %v868_v7 = vld [vmem:[%s2964_s8 + $0xe0] sm:$0xff] }
 0x139   : > { %1838 = vmatprep.subr.bf16.mxu0 %v1837_v44  ;;  %v850_v2 = vld [vmem:[%s2964_s8 + $0x50] sm:$0xff]  ;;  %v851_v3 = vld [vmem:[%s2964_s8 + $0x58] sm:$0xff]  ;;  %v1845_v5 = vpack.c.bf16 %v751_v62, %v750_v61  ;;  %v869_v8 = vld [vmem:[%s2964_s8 + $0xe8] sm:$0xff] }
 0x13a   : > { %1872 = vmatpush3.bf16.msra.mxu1 %v1871_v49  ;;  %v734_v4 = vld [vmem:[%s2958_s20 + $0x50] sm:$0xff]  ;;  %v735_v6 = vld [vmem:[%s2958_s20 + $0x58] sm:$0xff]  ;;  %v752_v9 = vld [vmem:[%s2958_s20 + $0xe0] sm:$0xff]  ;;  %v1879_v11 = vpack.c.bf16 %v851_v3, %v850_v2  ;;  %v1881_v15 = vpack.c.bf16 %v869_v8, %v868_v7 }
 0x13b   : > { %1874 = vmatprep.subr.bf16.mxu1 %v1873_v53  ;;  %v753_v10 = vld [vmem:[%s2958_s20 + $0xe8] sm:$0xff]  ;;  %v852_v12 = vld [vmem:[%s2964_s8 + $0x60] sm:$0xff]  ;;  %v1847_v14 = vpack.c.bf16 %v735_v6, %v734_v4  ;;  %v870_v20 = vld [vmem:[%s2964_s8 + $0xf0] sm:$0xff] }
 0x13c   : > { %1840 = vmatpush3.bf16.msra.mxu0 %v1839_v52  ;;  %v839_v13 = vld [vmem:[%s578_s3 + $0x8] sm:$0xff]  ;;  %v736_v17 = vld [vmem:[%s2958_s20 + $0x60] sm:$0xff]  ;;  %v1849_v19 = vpack.c.bf16 %v753_v10, %v752_v9  ;;  %v754_v23 = vld [vmem:[%s2958_s20 + $0xf0] sm:$0xff] }
 0x13d   : > { %1842 = vmatprep.subr.bf16.mxu0 %v1841_v57  ;;  %v853_v16 = vld [vmem:[%s2964_s8 + $0x68] sm:$0xff]  ;;  %v871_v21 = vld [vmem:[%s2964_s8 + $0xf8] sm:$0xff]  ;;  %943 = vmatprep.mubr.f32.mxu1 %v839_v13  ;;  %v854_v28 = vld [vmem:[%s2964_s8 + $0x70] sm:$0xff] }
 0x13e   : > { %1876 = vmatpush3.bf16.msra.mxu1 %v1875_v63  ;;  %v737_v18 = vld [vmem:[%s2958_s20 + $0x68] sm:$0xff]  ;;  %v755_v24 = vld [vmem:[%s2958_s20 + $0xf8] sm:$0xff]  ;;  %v1883_v25 = vpack.c.bf16 %v853_v16, %v852_v12  ;;  %v1885_v27 = vpack.c.bf16 %v871_v21, %v870_v20  ;;  %v738_v31 = vld [vmem:[%s2958_s20 + $0x70] sm:$0xff] }
 0x13f   : > { %1878 = vmatprep.subr.bf16.mxu1 %v1877_v1  ;;  %v723_v22 = vld [vmem:[%s569_s27 + $0x8] sm:$0xff]  ;;  %v1851_v26 = vpack.c.bf16 %v737_v18, %v736_v17  ;;  %v1853_v30 = vpack.c.bf16 %v755_v24, %v754_v23  ;;  %v967_v33 = vld [vmem:[%s2966_s13 + $0x80] sm:$0xff]  ;;  %v969_v40 = vld [vmem:[%s2966_s13 + $0x90] sm:$0xff]  ;;  %v2460_v23 = vmov 0.0  }
 0x140   : > { %1844 = vmatpush3.bf16.msra.mxu0 %v1843_v0  ;;  %827 = vmatprep.mubr.f32.mxu0 %v723_v22  ;;  %v855_v29 = vld [vmem:[%s2964_s8 + $0x78] sm:$0xff]  ;;  %v968_v34 = vld [vmem:[%s2966_s13 + $0x88] sm:$0xff]  ;;  %v951_v38 = vld [vmem:[%s2966_s13] sm:$0xff]  ;;  %836 = vst.msk [vmem:[#allocation4] sm:$0xff] %vm834_vm1, %v2460_v23 }
 0x141   : > { %1846 = vmatprep.subr.bf16.mxu0 %v1845_v5  ;;  %v739_v32 = vld [vmem:[%s2958_s20 + $0x78] sm:$0xff]  ;;  %v1887_v35 = vpack.c.bf16 %v855_v29, %v854_v28  ;;  %v1889_v37 = vpack.c.bf16 %v968_v34, %v967_v33  ;;  %v952_v39 = vld [vmem:[%s2966_s13 + $0x8] sm:$0xff]  ;;  %v838_v42 = vld [vmem:[%s578_s3] sm:$0xff] }
 0x142   : > { %1880 = vmatpush3.bf16.msra.mxu1 %v1879_v11  ;;  %v1855_v36 = vpack.c.bf16 %v739_v32, %v738_v31  ;;  %v970_v41 = vld [vmem:[%s2966_s13 + $0x98] sm:$0xff]  ;;  %v722_v43 = vld [vmem:[%s569_s27] sm:$0xff]  ;;  %v1891_v44 = vpack.c.bf16 %v952_v39, %v951_v38  ;;  %v972_v49 = vld [vmem:[%s2966_s13 + $0xa8] sm:$0xff]  ;;  %v2462_v39 = vmov -inf  }
 0x143   : > { %1882 = vmatprep.subr.bf16.mxu1 %v1881_v15  ;;  %v1893_v45 = vpack.c.bf16 %v970_v41, %v969_v40  ;;  %v953_v46 = vld [vmem:[%s2966_s13 + $0x10] sm:$0xff]  ;;  %v954_v47 = vld [vmem:[%s2966_s13 + $0x18] sm:$0xff]  ;;  %v971_v48 = vld [vmem:[%s2966_s13 + $0xa0] sm:$0xff]  ;;  %835 = vst.msk [vmem:[#allocation3] sm:$0xff] %vm834_vm1, %v2462_v39 }
 0x144   : > { %1848 = vmatpush3.bf16.msra.mxu0 %v1847_v14  ;;  %v1895_v50 = vpack.c.bf16 %v954_v47, %v953_v46  ;;  %v1897_v51 = vpack.c.bf16 %v972_v49, %v971_v48  ;;  %v955_v52 = vld [vmem:[%s2966_s13 + $0x20] sm:$0xff]  ;;  %v956_v53 = vld [vmem:[%s2966_s13 + $0x28] sm:$0xff]  ;;  %v973_v54 = vld [vmem:[%s2966_s13 + $0xb0] sm:$0xff] }
 0x145   : > { %1850 = vmatprep.subr.bf16.mxu0 %v1849_v19  ;;  %v974_v55 = vld [vmem:[%s2966_s13 + $0xb8] sm:$0xff]  ;;  %v1899_v56 = vpack.c.bf16 %v956_v53, %v955_v52  ;;  %v957_v58 = vld [vmem:[%s2966_s13 + $0x30] sm:$0xff]  ;;  %v975_v60 = vld [vmem:[%s2966_s13 + $0xc0] sm:$0xff] }
 0x146   : > { %1884 = vmatpush3.bf16.msra.mxu1 %v1883_v25  ;;  %v1901_v57 = vpack.c.bf16 %v974_v55, %v973_v54  ;;  %v958_v59 = vld [vmem:[%s2966_s13 + $0x38] sm:$0xff]  ;;  %v976_v61 = vld [vmem:[%s2966_s13 + $0xc8] sm:$0xff]  ;;  %v959_v0 = vld [vmem:[%s2966_s13 + $0x40] sm:$0xff] }
 0x147   : > { %1886 = vmatprep.subr.bf16.mxu1 %v1885_v27  ;;  %v1903_v62 = vpack.c.bf16 %v958_v59, %v957_v58  ;;  %v1905_v63 = vpack.c.bf16 %v976_v61, %v975_v60  ;;  %v960_v1 = vld [vmem:[%s2966_s13 + $0x48] sm:$0xff]  ;;  %v977_v2 = vld [vmem:[%s2966_s13 + $0xd0] sm:$0xff]  ;;  %v978_v3 = vld [vmem:[%s2966_s13 + $0xd8] sm:$0xff] }
 0x148   : > { %1852 = vmatpush3.bf16.msra.mxu0 %v1851_v26  ;;  %v1907_v4 = vpack.c.bf16 %v960_v1, %v959_v0  ;;  %v1909_v5 = vpack.c.bf16 %v978_v3, %v977_v2  ;;  %v961_v6 = vld [vmem:[%s2966_s13 + $0x50] sm:$0xff]  ;;  %v962_v7 = vld [vmem:[%s2966_s13 + $0x58] sm:$0xff]  ;;  %v979_v8 = vld [vmem:[%s2966_s13 + $0xe0] sm:$0xff] }
 0x149   : > { %1854 = vmatprep.subr.bf16.mxu0 %v1853_v30  ;;  %v980_v9 = vld [vmem:[%s2966_s13 + $0xe8] sm:$0xff]  ;;  %v1911_v10 = vpack.c.bf16 %v962_v7, %v961_v6  ;;  %v963_v12 = vld [vmem:[%s2966_s13 + $0x60] sm:$0xff]  ;;  %v981_v14 = vld [vmem:[%s2966_s13 + $0xf0] sm:$0xff] }
 0x14a   : > { %1888 = vmatpush3.bf16.msra.mxu1 %v1887_v35  ;;  %v1913_v11 = vpack.c.bf16 %v980_v9, %v979_v8  ;;  %v964_v13 = vld [vmem:[%s2966_s13 + $0x68] sm:$0xff]  ;;  %v982_v15 = vld [vmem:[%s2966_s13 + $0xf8] sm:$0xff]  ;;  %v965_v18 = vld [vmem:[%s2966_s13 + $0x70] sm:$0xff] }
 0x14b   : > { %v1915_v16 = vpack.c.bf16 %v964_v13, %v963_v12  ;;  %v1917_v17 = vpack.c.bf16 %v982_v15, %v981_v14  ;;  %v966_v19 = vld [vmem:[%s2966_s13 + $0x78] sm:$0xff]  ;;  %v949_v22 = vld [vmem:[%s587_s24] sm:$0xff]  ;;  %1820 = vmatprep.subr.mxu1 %v2460_v23  ;;  %v1254_v55 = vld [vmem:[%s2989_s23 + $0x8] sm:$0xff] }
 0x14c   : > { %1856 = vmatpush3.bf16.msra.mxu0 %v1855_v36  ;;  %v1919_v20 = vpack.c.bf16 %v966_v19, %v965_v18  ;;  %v950_v21 = vld [vmem:[%s587_s24 + $0x8] sm:$0xff]  ;;  %v1689_v25 = vld [vmem:[%s706_s14] ss:$0 sm:$0xff]  ;;  %v1255_v59 = vld [vmem:[%s2989_s23 + $0x10] sm:$0xff] }
 0x14d   : > { %1890 = vmatprep.subr.bf16.mxu0 %v1889_v37  ;;  %944 = vmatmul.mubr.f32.vlgmr.msra.gmra.mrb[0].mxu1 %v838_v42  ;;  %v1688_v29 = vld [vmem:[%s703_s18] ss:$0 sm:$0xff]  ;;  %v1258_v60 = vld [vmem:[%s2989_s23 + $0x28] sm:$0xff]  ;;  %v1260_v61 = vld [vmem:[%s2989_s23 + $0x38] sm:$0xff]  ;;  %s3343_s18 = sld [smem:[#allocation47_spill]] (%p1360_p0) }
 0x14e   : > { %1822 = vmatprep.mubr.msk.f32.mxu1 %vm2461_vm0, %v2460_v23  ;;  %v1690_v35 = vld [vmem:[%s709_s15] ss:$0 sm:$0xff]  ;;  %v1259_v1 = vld [vmem:[%s2989_s23 + $0x30] sm:$0xff]  ;;  %v1262_v2 = vld [vmem:[%s2989_s23 + $0x48] sm:$0xff] }
 0x14f   : > { %828 = vmatmul.mubr.f32.vlgmr.msra.gmra.mrb[0].mxu0 %v722_v43  ;;  %v2463_v43 = vmov 0   ;;  %v1257_v0 = vld [vmem:[%s2989_s23 + $0x20] sm:$0xff]  ;;  %v1264_v3 = vld [vmem:[%s2989_s23 + $0x58] sm:$0xff]  ;;  %v1263_v7 = vld [vmem:[%s2989_s23 + $0x50] sm:$0xff] }
 0x150   : > { %1892 = vmatpush3.bf16.msra.mxu0 %v1891_v44  ;;  %1054 = vmatprep.mubr.f32.mxu0 %v950_v21  ;;  %v1131_v44 = vld [vmem:[#allocation3] sm:$0xff]  ;;  %v1266_v8 = vld [vmem:[%s2989_s23 + $0x68] sm:$0xff]  ;;  %v1268_v9 = vld [vmem:[%s2989_s23 + $0x78] sm:$0xff] }
 0x151   : > { %1894 = vmatprep.subr.bf16.mxu0 %v1893_v45  ;;  %2094 = vset.pattern.permute.xlu0 %v2463_v43  ;;  %v1261_v6 = vld [vmem:[%s2989_s23 + $0x40] sm:$0xff]  ;;  %v1267_v13 = vld [vmem:[%s2989_s23 + $0x70] sm:$0xff]  ;;  %v1270_v14 = vld [vmem:[%s2989_s23 + $0x88] sm:$0xff] }
 0x152   : > { %2095 = vset.pattern.permute.xlu1 %v2463_v43  ;;  %v1265_v12 = vld [vmem:[%s2989_s23 + $0x60] sm:$0xff]  ;;  %v1272_v15 = vld [vmem:[%s2989_s23 + $0x98] sm:$0xff]  ;;  %v1271_v19 = vld [vmem:[%s2989_s23 + $0x90] sm:$0xff] }
 0x153   : > { %v1269_v18 = vld [vmem:[%s2989_s23 + $0x80] sm:$0xff]  ;;  %v1276_v21 = vld [vmem:[%s2989_s23 + $0xb8] sm:$0xff]  ;;  %v1148_v39 = vld [vmem:[#allocation4] sm:$0xff] }
 0x154   : > { %1896 = vmatpush3.bf16.msra.mxu0 %v1895_v50 }
 0x155   : > { %1898 = vmatprep.subr.bf16.mxu0 %v1897_v51 }
 0x158   : > { %1900 = vmatpush3.bf16.msra.mxu0 %v1899_v56  ;;  %v1256_v56 = vld [vmem:[%s2989_s23 + $0x18] sm:$0xff] }
 0x159   : > { %1902 = vmatprep.subr.bf16.mxu0 %v1901_v57  ;;  %v1253_v57 = vld [vmem:[%s2989_s23] sm:$0xff]  ;;  %v1921_v58 = vpack.c.bf16 %v1256_v56, %v1254_v55 }
 0x15c   : > { %1904 = vmatpush3.bf16.msra.mxu0 %v1903_v62  ;;  %v1923_v62 = vpack.c.bf16 %v1255_v59, %v1253_v57 }
 0x15d   : > { %1906 = vmatprep.subr.bf16.mxu0 %v1905_v63  ;;  %v1925_v63 = vpack.c.bf16 %v1260_v61, %v1258_v60  ;;  %v1367_v60 = vld [vmem:[%s3343_s18] sm:$0x3] (%p1360_p0) }
 0x160   : > { %1908 = vmatpush3.bf16.msra.mxu0 %v1907_v4  ;;  %v1927_v4 = vpack.c.bf16 %v1259_v1, %v1257_v0 }
 0x161   : > { %1910 = vmatprep.subr.bf16.mxu0 %v1909_v5  ;;  %v1929_v5 = vpack.c.bf16 %v1264_v3, %v1262_v2 }
 0x164   : > { %1912 = vmatpush3.bf16.msra.mxu0 %v1911_v10  ;;  %v1931_v10 = vpack.c.bf16 %v1263_v7, %v1261_v6 }
 0x165   : > { %1914 = vmatprep.subr.bf16.mxu0 %v1913_v11  ;;  %v1933_v11 = vpack.c.bf16 %v1268_v9, %v1266_v8 }
 0x168   : > { %1916 = vmatpush3.bf16.msra.mxu0 %v1915_v16  ;;  %v1935_v16 = vpack.c.bf16 %v1267_v13, %v1265_v12 }
 0x169   : > { %1918 = vmatprep.subr.bf16.mxu0 %v1917_v17  ;;  %v1937_v17 = vpack.c.bf16 %v1272_v15, %v1270_v14 }
 0x16c   : > { %1920 = vmatpush3.bf16.msra.mxu0 %v1919_v20  ;;  %v1274_v20 = vld [vmem:[%s2989_s23 + $0xa8] sm:$0xff] }
 0x16d   : > { %1815 = vmatprep.subr.mxu0 %v2460_v23 }
 0x16f   : > { %1055 = vmatmul.mubr.f32.vlgmr.msra.gmra.mrb[2].mxu0 %v949_v22  ;;  %v1939_v22 = vpack.c.bf16 %v1271_v19, %v1269_v18 }
 0x170   : > { %1817 = vmatprep.mubr.msk.f32.mxu0 %vm2461_vm0, %v2460_v23 }
 0x220   : > { %v1773_v24 = vpop.f32.mrb[0].mxu1 }
 0x221   : > { %v1774_v26 = vpop.f32.mrb[1].mxu1 }
 0x222   : > { %v1738_v27 = vpop.f32.mrb[0].mxu0  ;;  %v1775_v28 = vadd.f32 %v1774_v26, %v1773_v24  ;;  %v1273_v24 = vld [vmem:[%s2989_s23 + $0xa0] sm:$0xff]  ;;  %v1278_v26 = vld [vmem:[%s2989_s23 + $0xc8] sm:$0xff] }
 0x223   : > { %v1739_v30 = vpop.f32.mrb[1].mxu0 }
 0x224   : > { %v1740_v31 = vadd.f32 %v1739_v30, %v1738_v27  ;;  %v946_v32 = vadd.f32 %v1775_v28, %v1689_v25  ;;  %v1275_v25 = vld [vmem:[%s2989_s23 + $0xb0] sm:$0xff]  ;;  %v1280_v27 = vld [vmem:[%s2989_s23 + $0xd8] sm:$0xff]  ;;  %v1277_v30 = vld [vmem:[%s2989_s23 + $0xc0] sm:$0xff] }
 0x225   : > { %v1943_v28 = vpack.c.bf16 %v1275_v25, %v1273_v24 }
 0x226   : > { %v830_v33 = vadd.f32 %v1740_v31, %v1688_v29  ;;  %1816 = vmatpush3.xpose.msra.mxu0 %v946_v32  ;;  %v1945_v29 = vpack.c.bf16 %v1280_v27, %v1278_v26  ;;  %v1279_v31 = vld [vmem:[%s2989_s23 + $0xd0] sm:$0xff]  ;;  %v1282_v32 = vld [vmem:[%s2989_s23 + $0xe8] sm:$0xff] }
 0x229   : > { %1818 = vmatmul.mubr.f32.vlgmr.msra.gmra.mrb[4].mxu0 %v830_v33  ;;  %v1284_v33 = vld [vmem:[%s2989_s23 + $0xf8] sm:$0xff] }
 0x242   : > { %v1808_v34 = vpop.f32.mrb[2].mxu0 }
 0x243   : > { %v1809_v36 = vpop.f32.mrb[3].mxu0 }
 0x244   : > { %v1810_v37 = vadd.f32 %v1809_v36, %v1808_v34  ;;  %v1947_v34 = vpack.c.bf16 %v1279_v31, %v1277_v30  ;;  %v1281_v36 = vld [vmem:[%s2989_s23 + $0xe0] sm:$0xff] }
 0x246   : > { %v1057_v38 = vadd.f32 %v1810_v37, %v1690_v35  ;;  %v1949_v35 = vpack.c.bf16 %v1284_v33, %v1282_v32  ;;  %v1283_v37 = vld [vmem:[%s2989_s23 + $0xf0] sm:$0xff] }
 0x248   : > { %1821 = vmatpush3.msra.mxu1 %v1057_v38  ;;  %v1951_v38 = vpack.c.bf16 %v1283_v37, %v1281_v36 }
 0x249   : > { %1922 = vmatprep.subr.bf16.mxu1 %v1921_v58  ;;  %v1369_v58 = vlaneseq (%p1360_p0) }
 0x24b   : > { %v1370_v59 = vshrl.u32 (%p1360_p0), %v1369_v58, 7 }
 0x24d   : > { %v1371_v61 = vsub.s32 (%p1360_p0), 0, %v1370_v59 }
 0x24f   : > { %v1372_v1 = vrot.slane (%p1360_p0), %v1367_v60, %v1371_v61 }
 0x2fc   : > { %v1127_v40 = vpop.f32.mrb[4].mxu0 }
 0x2fd   : > { %v1819_v41 = vpop.f32.mrb[5].mxu0  ;;  %v1133_v42 = vsel %vm1132_vm2, %v1127_v40, -inf }
 0x2fe   : > { %1134 = vmax.xlane.f32.xlu0 %v1133_v42 }
 0x38b   : > { %v1135_v45 = vpop.xlane.xlu0 %1134 }
 0x38c   : > { %v1136_v46 = vmax.f32 %v1131_v44, %v1135_v45 }
 0x38e   : > { %v1137_v47 = vsub.f32 %v1131_v44, %v1136_v46  ;;  %1238 = vst.msk [vmem:[#allocation3] sm:$0xff] %vm834_vm1, %v1136_v46  ;;  %1142 = vperm.xlu0 %2094, %v1136_v46  }
 0x390   : > { %v1138_v53 = vmul.f32 1.442695, %v1137_v47 }
 0x40d   : > { %v1143_v48 = vpop.permute.xlu0 %1142 }
 0x40e   : > { %v1145_v49 = vsub.f32 %v1127_v40, %v1143_v48 }
 0x410   : > { %v1146_v50 = vmul.f32 1.442695, %v1145_v49 }
 0x412   : > { %2096 = vpow2.f32 %v1146_v50 }
 0x413   : > { %2098 = vpow2.f32 %v1138_v53  ;;  %v1252_v53 = vld [vmem:[#allocation6 + $0x8] sm:$0xff] }
 0x41c   : > { %v2097_v51 = vpop.eup %2096 }
 0x41d   : > { %1823 = vmatmul.mubr.msk.f32.vlgmr.msra.gmra.mrb[2].mxu1 %vm1132_vm2, %v2097_v51  ;;  %v1150_v52 = vsel %vm1132_vm2, %v2097_v51, 0.0  ;;  %v3123_v54 = vpop.eup %2098 }
 0x41e   : > { %1151 = vadd.xlane.f32.xlu1 %v1150_v52  ;;  %1349 = vmatprep.mubr.f32.mxu1 %v2460_v23  ;;  %v1941_v23 = vpack.c.bf16 %v1276_v21, %v1274_v20  ;;  %v1149_v40 = vmul.f32 %v3123_v54, %v1148_v39  ;;  %v1251_v52 = vld [vmem:[#allocation6] sm:$0xff] }
 0x41f   : > { %1924 = vmatpush1.bf16.msra.mxu1 %v1923_v62  ;;  %v1375_v62 = vsub.s32 (%p1360_p0), 1, %v1370_v59 }
 0x420   : > { %1926 = vmatprep.subr.bf16.mxu1 %v1925_v63 }
 0x421   : > { %v1376_v2 = vrot.slane (%p1360_p0), %v1367_v60, %v1375_v62 }
 0x423   : > { %1928 = vmatpush1.bf16.msra.mxu1 %v1927_v4 }
 0x424   : > { %1930 = vmatprep.subr.bf16.mxu1 %v1929_v5 }
 0x427   : > { %1932 = vmatpush1.bf16.msra.mxu1 %v1931_v10 }
 0x428   : > { %1934 = vmatprep.subr.bf16.mxu1 %v1933_v11 }
 0x42b   : > { %1936 = vmatpush1.bf16.msra.mxu1 %v1935_v16 }
 0x42c   : > { %1938 = vmatprep.subr.bf16.mxu1 %v1937_v17 }
 0x42f   : > { %1159 = vperm.xlu1 %2095, %v3123_v54   ;;  %1940 = vmatpush1.bf16.msra.mxu1 %v1939_v22 }
 0x430   : > { %1942 = vmatprep.subr.bf16.mxu1 %v1941_v23 }
 0x433   : > { %1944 = vmatpush1.bf16.msra.mxu1 %v1943_v28 }
 0x434   : > { %1946 = vmatprep.subr.bf16.mxu1 %v1945_v29 }
 0x437   : > { %1948 = vmatpush1.bf16.msra.mxu1 %v1947_v34 }
 0x438   : > { %1950 = vmatprep.subr.bf16.mxu1 %v1949_v35 }
 0x43b   : > { %1952 = vmatpush1.bf16.msra.mxu1 %v1951_v38 }
 0x4ab   : > { %v1152_v41 = vpop.xlane.xlu1 %1151 }
 0x4ac   : > { %v1153_v42 = vadd.f32 %v1152_v41, %v1149_v40 }
 0x4ae   : > { %1155 = vst.msk [vmem:[#allocation4] sm:$0xff] %vm834_vm1, %v1153_v42 }
 0x4af   : > { %v1160_v47 = vpop.permute.xlu1 %1159 }
 0x4b0   : > { %v1162_v48 = vmul.f32 0.0, %v1160_v47 }
 0x4b5   : > { %v1243_v43 = vld [vmem:[#allocation4] sm:$0xff] }
 0x4b6   : > { %2100 = vrcp.f32 %v1243_v43 }
 0x4c0   : > { %v2101_v44 = vpop.eup %2100 }
 0x4c1   : > { %1247 = vperm.xlu1 %2095, %v2101_v44  }
 0x4f0   : > { %v1232_v45 = vpop.f32.mrb[2].mxu1 }
 0x4f1   : > { %v1824_v46 = vpop.f32.mrb[3].mxu1  ;;  %v1236_v49 = vadd.f32 %v1232_v45, %v1162_v48 }
 0x540   : > { %v1248_v50 = vpop.permute.xlu1 %1247 }
 0x541   : > { %v1250_v51 = vmul.f32 %v1248_v50, %v1236_v49 }
 0x543   : > { %1350 = vmatmul.mubr.f32.vlgmr.msra.gmra.mrb[4].mxu1 %v1250_v51 }
 0x614   : > { %1364 = sbr.rel (!%p1360_p0) target bundleno = 1573 (0x625), region = 108 }
 0x616   : > { %v1351_v54 = vpop.f32.mrb[4].mxu1 }
 0x617   : > { %v1356_v55 = vadd.f32 %v1351_v54, %v1251_v52  ;;  %v1353_v56 = vpop.f32.mrb[5].mxu1 }
 0x618   : > { %v1357_v57 = vadd.f32 %v1353_v56, %v1252_v53 }
 0x619   : > { %1358 = vst [vmem:[#allocation6] sm:$0xff] %v1356_v55 }
 0x61a   : > { %1359 = vst [vmem:[#allocation6 + $0x8] sm:$0xff] %v1357_v57 }
 0x620   : > { %v1365_v63 = vld [vmem:[#allocation6] sm:$0xff] }
 0x621   : > { %v1366_v0 = vld [vmem:[#allocation6 + $0x8] sm:$0xff]  ;;  %v1379_v3 = vadd.f32 %v1372_v1, %v1365_v63 }
 0x622   : > { %v1380_v4 = vadd.f32 %v1376_v2, %v1366_v0 }
 0x623   : > { %1381 = vst [vmem:[%s2992_s4] sm:$0xff] %v1379_v3 }
 0x624   : > { %1382 = vst [vmem:[%s2992_s4 + $0x8] sm:$0xff] %v1380_v4 }
 0x625 PF: > { %s3344_s19 = sld [smem:[#allocation29_spill]]  ;;  %s3345_s17 = sld [smem:[#allocation39_spill]] }
 0x626   : > { %s3346_s29 = sld [smem:[#allocation48_spill]]  ;;  %s1400_s15 = sshll.u32 %s2992_s4, 4  ;;  %s1401_s15 = int_to_ptr.vmem [resolvable:$true] %s1400_s15 }
 0x627   : > { %s1384_s23 = scalar_lea.sflag [#allocation9], %s2939_s28  ;;  %s2312_s27 = scalar_lea.vmem %s1401_s15, 256 }
 0x628   : > { %p2313_p11 = scmp.ne.s32.totalorder %s1401_s15, %s2312_s27  ;;  %s2464_s3 = smov [#allocation19]  }
 0x629   : > { %s2316_s11 = sshll.u32 %s2464_s3, 4  ;;  %s2317_s11 = int_to_ptr.vmem [resolvable:$false] %s2316_s11 }
 0x62a   : > { %s2318_s20 = scalar_lea.vmem %s2317_s11, 512  ;;  %p2319_p6 = scmp.lt.s32.totalorder %s1401_s15, %s2317_s11 }
 0x62b   : > { %s1705_s10 = sshll.u32 %s3344_s19, 8  ;;  %p3347_p10 = scmp.ne.s32.totalorder %s3345_s17, 0 }
 0x62c   : > { %s3170_s26 = scalar_lea.hbm %s3346_s29, %s1705_s10  ;;  %p2320_p4 = scmp.lt.s32.totalorder %s2318_s20, %s2312_s27 }
 0x62d   : > { %p2314_p12 = pnand %p2313_p11, %p3347_p10 }
 0x62e   : > { %p2321_p7 = por %p2320_p4, %p2319_p6 }
 0x62f   : > { %p2315_p3 = pneg %p2314_p12 }
 0x631   : > { %p2322_p1 = pnand %p2321_p7, %p2315_p3 }
 0x633   : > { %2325 = shalt.err (!%p2322_p1)
}
 0x634   : > { %s2326_s28 = scalar_lea.hbm %s3170_s26, 256  ;;  %s2330_s24 = scalar_lea.hbm %s3346_s29, 512 }
 0x635   : > { %p2327_p5 = scmp.ne.s32.totalorder %s3170_s26, %s2326_s28  ;;  %p2331_p9 = scmp.lt.u32.totalorder %s3170_s26, %s3346_s29 }
 0x636   : > { %p2332_p8 = scmp.lt.u32.totalorder %s2330_s24, %s2326_s28  ;;  %p2334_p11 = scmp.lt.u32.totalorder %s2326_s28, %s3170_s26 }
 0x637   : > { %p2328_p13 = pnand %p2327_p5, %p3347_p10 }
 0x638   : > { %p2333_p0 = por %p2332_p8, %p2331_p9 }
 0x639   : > { %p2329_p2 = pneg %p2328_p13 }
 0x63a   : > { %p2335_p12 = por %p2334_p11, %p2333_p0 }
 0x63c   : > { %p2336_p3 = pnand %p2335_p12, %p2329_p2 }
 0x63e   : > { %2339 = shalt.err (!%p2336_p3)
}
 0x63f   : > { %1967 = dma.vmem_to_hbm [thread:$0]  (%p3347_p10), %s1401_s15, 256, %s3170_s26, %s1384_s23  }
 0x640 PF: > { %s3348_s1 = sld [smem:[#allocation31_spill]]  ;;  %s3349_s30 = sld [smem:[#allocation27_spill]] }
 0x641   : > { %s3350_s12 = sld [smem:[#allocation40_spill]] }
 0x646   : > { %p1996_p6 = scmp.ge.s32.totalorder %s3348_s1, 2  ;;  %s1412_s16 = sand.u32 1, %s3349_s30  }
 0x647   : > { %p3351_p4 = scmp.ne.s32.totalorder %s3350_s12, 0  ;;  %s1413_s18 = scalar_lea.sflag [#allocation9], %s1412_s16 }
 0x649   : > { %p1992_p7 = pnand %p1996_p6, %p3351_p4 }
 0x64b   : > { %2401 = dma.done.wait (!%p1992_p7), %s1413_s18, 256  }
 0x64c   : > { %2403 = vsyncadd (!%p1992_p7), %s1413_s18, 4294967040  ;;  %s36_s27 = sadd.s32 1, %s3348_s1   ;;  %s3352_s17 = sld [smem:[#allocation25_spill]] }
 0x64d   : > { %p33_p1 = scmp.ge.s32.totalorder %s36_s27, 6   ;;  %s3353_s18 = sld [smem:[#allocation26_spill]] }
 0x64e   : > { %s3354_s19 = sld [smem:[#allocation36_spill]]  ;;  %s3355_s10 = sld [smem:[#allocation37_spill]] }
 0x64f   : > { %s3356_s24 = sld [smem:[#allocation30_spill]]  ;;  %s3357_s14 = sld [smem:[#allocation33_spill]] }
 0x650   : > { %s3358_s26 = sld [smem:[#allocation34_spill]]  ;;  %s3359_s20 = smov %s2422_s21 }
 0x651   : > { %s3360_s21 = smov %s2426_s22  ;;  %s3362_s23 = smov %s2438_s25 }
 0x652   :  { %35 = sbr.rel (!%p33_p1) target bundleno = 24 (0x18), region = 206 }
 0x654   : > { %s3361_s22 = smov %s3355_s10 }
 0x655   : > { %s3363_s25 = smov %s3357_s14 }
 0x659   :  { %1418 = vsyncpa [#allocation8], 1 }
 0x65a   :  { %1420 = vsyncpa [#allocation8 + $0x1], 1 }
 0x65b   :  { %1421 = vsyncpa [#allocation11], 1 }
 0x65c   :  { %1423 = vsyncpa [#allocation11 + $0x1], 1 }
 0x65d   :  { %1424 = vsyncpa [#allocation14], 1 }
 0x65e   :  { %1426 = vsyncpa [#allocation14 + $0x1], 1 }
 0x65f   :  { %1427 = vsyncpa [#allocation17], 1 }
 0x660   :  { %1429 = vsyncpa [#allocation17 + $0x1], 1 }
 0x661   :  { %1430 = vsyncpa [#allocation9], 1 }
 0x662   :  { %1432 = vsyncpa [#allocation9 + $0x1], 1 }

</bundles_post_ra>
